<compile_context>
chip_gen: v7x
topology: tpu7x:2x2x1
jax: 0.10.0
libtpu: 0.0.40
codegen_flags: <defaults>
</compile_context>

<pallas_src>
import functools

import jax
import jax.numpy as jnp
from jax.experimental import pallas as pl
from jax.experimental.pallas import tpu as pltpu

X_SIZE = 167
BN_EPS = 1e-5
LANE = 128


def _round_up(a, m):
    return (a + m - 1) // m * m


# ----------------------------------------------------------------------------
# Pallas kernel: one batch tile of the whole HMCN-F forward
# ----------------------------------------------------------------------------
def hmcnf_kernel(x_ref, wx_ref, bg_ref, wh_ref, wloc_ref, bloc_ref,
                 wlo_ref, wgo_ref, bout_ref, o_ref, *, h):
    x = x_ref[...]                                              # (TB, 167)

    # Fused x-projection for all 4 global blocks: (TB,167) x (167,4h=128).
    xp = jnp.dot(x, wx_ref[...], preferred_element_type=jnp.float32) + bg_ref[...]

    # Global chain (BN already folded into Wh/bias), r_i = relu(z_i).
    r1 = jnp.maximum(xp[:, 0 * h:1 * h], 0.0)
    r2 = jnp.maximum(
        jnp.dot(r1, wh_ref[0], preferred_element_type=jnp.float32) + xp[:, 1 * h:2 * h], 0.0)
    r3 = jnp.maximum(
        jnp.dot(r2, wh_ref[1], preferred_element_type=jnp.float32) + xp[:, 2 * h:3 * h], 0.0)
    r4 = jnp.maximum(
        jnp.dot(r3, wh_ref[2], preferred_element_type=jnp.float32) + xp[:, 3 * h:4 * h], 0.0)

    # Fused local heads: block-diagonal (4h, 4h) weight over concat(r1..r4).
    cat_r = jnp.concatenate([r1, r2, r3, r4], axis=1)           # (TB, 4h)
    al = jnp.maximum(
        jnp.dot(cat_r, wloc_ref[...], preferred_element_type=jnp.float32) + bloc_ref[...],
        0.0)                                                    # (TB, 4h)

    # Single lane-dense output slab: [Pg | Pl1 | Pl2 | Pl3 | Pl4 | pad] (128 lanes).
    logits = (jnp.dot(al, wlo_ref[...], preferred_element_type=jnp.float32)
              + jnp.dot(r4, wgo_ref[...], preferred_element_type=jnp.float32)
              + bout_ref[...])
    o_ref[...] = jax.nn.sigmoid(logits)


# ----------------------------------------------------------------------------
# Raw (PyTorch-shaped) parameters and one-time fold/fuse preparation
# ----------------------------------------------------------------------------
def make_raw_params(key, h, C, Cl):
    """Deterministic synthetic parameters mirroring the PyTorch module.
    Linear weights stored as (in_features, out_features) so y = x @ W + b."""
    ks = iter(jax.random.split(key, 64))

    def lin(i, o):
        w = jax.random.normal(next(ks), (i, o), jnp.float32) / jnp.sqrt(i)
        b = 0.05 * jax.random.normal(next(ks), (1, o), jnp.float32)
        return w, b

    def bn(f):
        gamma = 1.0 + 0.1 * jax.random.normal(next(ks), (1, f), jnp.float32)
        beta = 0.05 * jax.random.normal(next(ks), (1, f), jnp.float32)
        mean = 0.1 * jax.random.normal(next(ks), (1, f), jnp.float32)
        var = 1.0 + 0.1 * jax.random.uniform(next(ks), (1, f), jnp.float32)
        return gamma, beta, mean, var

    p = {}
    p["g1"], p["bn1"] = lin(X_SIZE, h), bn(h)
    p["g2"], p["bn2"] = lin(h + X_SIZE, h), bn(h)
    p["g3"], p["bn3"] = lin(h + X_SIZE, h), bn(h)
    p["g4"], p["bn4"] = lin(h + X_SIZE, h), bn(h)
    p["gout"] = lin(h, C)
    for i, cl in enumerate(Cl, 1):
        p[f"l{i}"], p[f"bnl{i}"] = lin(h, h), bn(h)
        p[f"lo{i}"] = lin(h, cl)
    return p


def _bn_scale_shift(bn):
    gamma, beta, mean, var = bn
    scale = gamma / jnp.sqrt(var + BN_EPS)
    shift = beta - mean * scale
    return scale, shift


def build_fused_params(raw, h, C, Cl):
    """Fold eval-mode BatchNorm into downstream weights and fuse/pack arrays."""
    out_dim = C + sum(Cl)
    out_pad = _round_up(out_dim, LANE)

    sg, tg = [], []
    for name in ("bn1", "bn2", "bn3", "bn4"):
        s, t = _bn_scale_shift(raw[name])
        sg.append(s.reshape(h, 1))
        tg.append(t)

    W1, b1 = raw["g1"]
    W2, b2 = raw["g2"]
    W3, b3 = raw["g3"]
    W4, b4 = raw["g4"]
    Wh2, Wx2 = W2[:h], W2[h:]
    Wh3, Wx3 = W3[:h], W3[h:]
    Wh4, Wx4 = W4[:h], W4[h:]

    # Fold BN(ag_i) into the next global block's hidden weight + bias.
    Wh2_f = sg[0] * Wh2
    b2_f = b2 + tg[0] @ Wh2
    Wh3_f = sg[1] * Wh3
    b3_f = b3 + tg[1] @ Wh3
    Wh4_f = sg[2] * Wh4
    b4_f = b4 + tg[2] @ Wh4

    wx_full = jnp.concatenate([W1, Wx2, Wx3, Wx4], axis=1)        # (167, 4h)
    b_glob = jnp.concatenate([b1, b2_f, b3_f, b4_f], axis=1)      # (1, 4h)
    wh_stack = jnp.stack([Wh2_f, Wh3_f, Wh4_f], axis=0)           # (3, h, h)

    # Fused local heads: block-diagonal lw, packed low per output column range.
    w_loc = jnp.zeros((4 * h, 4 * h), jnp.float32)
    b_loc_parts = []
    w_lo = jnp.zeros((4 * h, out_pad), jnp.float32)
    b_out = jnp.zeros((1, out_pad), jnp.float32)

    off = C
    for i in range(4):
        lw, lb = raw[f"l{i + 1}"]
        low, lob = raw[f"lo{i + 1}"]
        ls, lt = _bn_scale_shift(raw[f"bnl{i + 1}"])
        lw_f = sg[i] * lw                       # fold BN(ag_i) into local lw
        lb_f = lb + tg[i] @ lw
        low_f = ls.reshape(h, 1) * low          # fold BN_L(i) into localOut
        lob_f = lob + lt @ low
        w_loc = w_loc.at[i * h:(i + 1) * h, i * h:(i + 1) * h].set(lw_f)
        b_loc_parts.append(lb_f)
        cl = Cl[i]
        w_lo = w_lo.at[i * h:(i + 1) * h, off:off + cl].set(low_f)
        b_out = b_out.at[:, off:off + cl].set(lob_f)
        off += cl
    b_loc = jnp.concatenate(b_loc_parts, axis=1)                  # (1, 4h)

    # Global output head (fold BN(ag4) into gow).
    gow, gob = raw["gout"]
    gow_f = sg[3] * gow
    gob_f = gob + tg[3] @ gow
    w_go = jnp.zeros((h, out_pad), jnp.float32).at[:, 0:C].set(gow_f)
    b_out = b_out.at[:, 0:C].set(gob_f)

    return dict(wx_full=wx_full, b_glob=b_glob, wh_stack=wh_stack,
                w_loc=w_loc, b_loc=b_loc, w_lo=w_lo, w_go=w_go, b_out=b_out)


# ----------------------------------------------------------------------------
# Wrapper: batch-tiled pallas_call + output slicing
# ----------------------------------------------------------------------------
@functools.partial(jax.jit, static_argnames=("h", "C", "Cl", "tb"))
def hmcnf_forward(x, fused, *, h, C, Cl, tb=512):
    B = x.shape[0]
    out_pad = fused["b_out"].shape[1]

    TB = min(tb, _round_up(B, 8))
    Bp = _round_up(B, TB)
    x_pad = jnp.pad(x, ((0, Bp - B), (0, 0))) if Bp != B else x
    grid = (Bp // TB,)

    def const2(shape):
        return pl.BlockSpec(shape, lambda i: (0, 0))

    out = pl.pallas_call(
        functools.partial(hmcnf_kernel, h=h),
        out_shape=jax.ShapeDtypeStruct((Bp, out_pad), jnp.float32),
        grid=grid,
        in_specs=[
            pl.BlockSpec((TB, X_SIZE), lambda i: (i, 0)),   # x (tiled over batch)
            const2((X_SIZE, 4 * h)),                        # wx_full
            const2((1, 4 * h)),                             # b_glob
            pl.BlockSpec((3, h, h), lambda i: (0, 0, 0)),   # wh_stack
            const2((4 * h, 4 * h)),                         # w_loc
            const2((1, 4 * h)),                             # b_loc
            const2((4 * h, out_pad)),                       # w_lo
            const2((h, out_pad)),                           # w_go
            const2((1, out_pad)),                           # b_out
        ],
        out_specs=pl.BlockSpec((TB, out_pad), lambda i: (i, 0)),
        compiler_params=pltpu.CompilerParams(
            dimension_semantics=("parallel",)),
    )(x_pad, fused["wx_full"], fused["b_glob"], fused["wh_stack"],
      fused["w_loc"], fused["b_loc"], fused["w_lo"], fused["w_go"],
      fused["b_out"])

    out = out[:B]
    offs = [0, C]
    for cl in Cl:
        offs.append(offs[-1] + cl)
    pg = out[:, offs[0]:offs[1]]
    pls = tuple(out[:, offs[i + 1]:offs[i + 2]] for i in range(4))
    return (pg,) + pls


# ----------------------------------------------------------------------------
# Pure-JAX reference mirroring the PyTorch module (eval mode)
# ----------------------------------------------------------------------------
def hmcnf_reference(x, raw):
    def relu_bn(z, bn):
        gamma, beta, mean, var = bn
        zr = jnp.maximum(z, 0.0)
        return (zr - mean) / jnp.sqrt(var + BN_EPS) * gamma + beta

    W1, b1 = raw["g1"]
    ag1 = relu_bn(x @ W1 + b1, raw["bn1"])

    def gblock(ag, name):
        W, b = raw[name]
        z = jnp.concatenate([ag, x], axis=1) @ W + b
        return relu_bn(z, raw["bn" + name[-1]])

    ag2 = gblock(ag1, "g2")
    ag3 = gblock(ag2, "g3")
    ag4 = gblock(ag3, "g4")

    def head(ag, i):
        lw, lb = raw[f"l{i}"]
        al = relu_bn(ag @ lw + lb, raw[f"bnl{i}"])
        low, lob = raw[f"lo{i}"]
        return jax.nn.sigmoid(al @ low + lob)

    pls = tuple(head(a, i + 1) for i, a in enumerate((ag1, ag2, ag3, ag4)))
    gow, gob = raw["gout"]
    pg = jax.nn.sigmoid(ag4 @ gow + gob)
    return (pg,) + pls


if __name__ == "__main__":
    B = 256          # small demo batch; tiled with TB=128 -> grid of 2
    H_SIZE = 32
    C = 4
    CL = (3, 5, 6, 7)

    key = jax.random.PRNGKey(0)
    kx, kp = jax.random.split(key)
    x = jax.random.normal(kx, (B, X_SIZE), jnp.float32)

    raw = make_raw_params(kp, H_SIZE, C, CL)
    fused = build_fused_params(raw, H_SIZE, C, CL)

    outs = hmcnf_forward(x, fused, h=H_SIZE, C=C, Cl=CL, tb=128)
    outs = jax.block_until_ready(outs)

    refs = hmcnf_reference(x, raw)
    for o, r in zip(outs, refs):
        assert o.shape == r.shape, (o.shape, r.shape)
        err = float(jnp.max(jnp.abs(o - r)))
        assert err < 1e-4, err

    print("KERNEL_OK")
</pallas_src>

<mosaic_0001>
module attributes {stable_mosaic.version = 11 : i64} {
  func.func @hmcnf_kernel(%arg0: i32, %arg1: memref<128x167xf32, #tpu.memory_space<vmem>>, %arg2: memref<167x128xf32, #tpu.memory_space<vmem>>, %arg3: memref<1x128xf32, #tpu.memory_space<vmem>>, %arg4: memref<3x32x32xf32, #tpu.memory_space<vmem>>, %arg5: memref<128x128xf32, #tpu.memory_space<vmem>>, %arg6: memref<1x128xf32, #tpu.memory_space<vmem>>, %arg7: memref<128x128xf32, #tpu.memory_space<vmem>>, %arg8: memref<32x128xf32, #tpu.memory_space<vmem>>, %arg9: memref<1x128xf32, #tpu.memory_space<vmem>>, %arg10: memref<128x128xf32, #tpu.memory_space<vmem>>) attributes {dimension_semantics = [#tpu.dimension_semantics<parallel>], iteration_bounds = array<i64: 2>, scalar_prefetch = 0 : i64, scratch_operands = 0 : i64, tpu.core_type = #tpu.core_type<tc>, window_params = [{transform_indices = @transform_0, window_bounds = array<i64: 128, 167>}, {pipeline_mode = #tpu.pipeline_mode<synchronous>, transform_indices = @transform_1, window_bounds = array<i64: 167, 128>}, {pipeline_mode = #tpu.pipeline_mode<synchronous>, transform_indices = @transform_2, window_bounds = array<i64: 1, 128>}, {pipeline_mode = #tpu.pipeline_mode<synchronous>, transform_indices = @transform_3, window_bounds = array<i64: 3, 32, 32>}, {pipeline_mode = #tpu.pipeline_mode<synchronous>, transform_indices = @transform_4, window_bounds = array<i64: 128, 128>}, {pipeline_mode = #tpu.pipeline_mode<synchronous>, transform_indices = @transform_5, window_bounds = array<i64: 1, 128>}, {pipeline_mode = #tpu.pipeline_mode<synchronous>, transform_indices = @transform_6, window_bounds = array<i64: 128, 128>}, {pipeline_mode = #tpu.pipeline_mode<synchronous>, transform_indices = @transform_7, window_bounds = array<i64: 32, 128>}, {pipeline_mode = #tpu.pipeline_mode<synchronous>, transform_indices = @transform_8, window_bounds = array<i64: 1, 128>}, {transform_indices = @transform_9, window_bounds = array<i64: 128, 128>}]} {
    %c0 = arith.constant 0 : index
    %c0_0 = arith.constant 0 : index
    %0 = vector.load %arg1[%c0, %c0_0] : memref<128x167xf32, #tpu.memory_space<vmem>>, vector<128x167xf32>
    %c0_1 = arith.constant 0 : index
    %c0_2 = arith.constant 0 : index
    %1 = vector.load %arg2[%c0_1, %c0_2] : memref<167x128xf32, #tpu.memory_space<vmem>>, vector<167x128xf32>
    %cst = arith.constant dense<0.000000e+00> : vector<128x128xf32>
    %2 = tpu.matmul %0, %1, %cst {dimension_numbers = #tpu.dot_dimension_numbers<[1], [0], [0], [1], [0, 0, 1, 1], [], []>} : vector<128x167xf32>, vector<167x128xf32>, vector<128x128xf32> -> vector<128x128xf32>
    %c0_3 = arith.constant 0 : index
    %c0_4 = arith.constant 0 : index
    %3 = vector.load %arg3[%c0_3, %c0_4] : memref<1x128xf32, #tpu.memory_space<vmem>>, vector<1x128xf32>
    %4 = vector.broadcast %3 : vector<1x128xf32> to vector<128x128xf32>
    %5 = arith.addf %2, %4 : vector<128x128xf32>
    %6 = vector.extract_strided_slice %5 {offsets = [0, 0], sizes = [128, 32], strides = [1, 1]} : vector<128x128xf32> to vector<128x32xf32>
    %cst_5 = arith.constant 0.000000e+00 : f32
    %7 = vector.broadcast %cst_5 : f32 to vector<128x32xf32>
    %8 = arith.maximumf %6, %7 : vector<128x32xf32>
    %c0_6 = arith.constant 0 : index
    %c0_7 = arith.constant 0 : index
    %c0_8 = arith.constant 0 : index
    %9 = vector.load %arg4[%c0_6, %c0_7, %c0_8] : memref<3x32x32xf32, #tpu.memory_space<vmem>>, vector<1x32x32xf32>
    %10 = vector.shape_cast %9 : vector<1x32x32xf32> to vector<32x32xf32>
    %cst_9 = arith.constant dense<0.000000e+00> : vector<128x32xf32>
    %11 = tpu.matmul %8, %10, %cst_9 {dimension_numbers = #tpu.dot_dimension_numbers<[1], [0], [0], [1], [0, 0, 1, 1], [], []>} : vector<128x32xf32>, vector<32x32xf32>, vector<128x32xf32> -> vector<128x32xf32>
    %12 = vector.extract_strided_slice %5 {offsets = [0, 32], sizes = [128, 32], strides = [1, 1]} : vector<128x128xf32> to vector<128x32xf32>
    %13 = arith.addf %11, %12 : vector<128x32xf32>
    %cst_10 = arith.constant 0.000000e+00 : f32
    %14 = vector.broadcast %cst_10 : f32 to vector<128x32xf32>
    %15 = arith.maximumf %13, %14 : vector<128x32xf32>
    %c1 = arith.constant 1 : index
    %c0_11 = arith.constant 0 : index
    %c0_12 = arith.constant 0 : index
    %16 = vector.load %arg4[%c1, %c0_11, %c0_12] : memref<3x32x32xf32, #tpu.memory_space<vmem>>, vector<1x32x32xf32>
    %17 = vector.shape_cast %16 : vector<1x32x32xf32> to vector<32x32xf32>
    %cst_13 = arith.constant dense<0.000000e+00> : vector<128x32xf32>
    %18 = tpu.matmul %15, %17, %cst_13 {dimension_numbers = #tpu.dot_dimension_numbers<[1], [0], [0], [1], [0, 0, 1, 1], [], []>} : vector<128x32xf32>, vector<32x32xf32>, vector<128x32xf32> -> vector<128x32xf32>
    %19 = vector.extract_strided_slice %5 {offsets = [0, 64], sizes = [128, 32], strides = [1, 1]} : vector<128x128xf32> to vector<128x32xf32>
    %20 = arith.addf %18, %19 : vector<128x32xf32>
    %cst_14 = arith.constant 0.000000e+00 : f32
    %21 = vector.broadcast %cst_14 : f32 to vector<128x32xf32>
    %22 = arith.maximumf %20, %21 : vector<128x32xf32>
    %c2 = arith.constant 2 : index
    %c0_15 = arith.constant 0 : index
    %c0_16 = arith.constant 0 : index
    %23 = vector.load %arg4[%c2, %c0_15, %c0_16] : memref<3x32x32xf32, #tpu.memory_space<vmem>>, vector<1x32x32xf32>
    %24 = vector.shape_cast %23 : vector<1x32x32xf32> to vector<32x32xf32>
    %cst_17 = arith.constant dense<0.000000e+00> : vector<128x32xf32>
    %25 = tpu.matmul %22, %24, %cst_17 {dimension_numbers = #tpu.dot_dimension_numbers<[1], [0], [0], [1], [0, 0, 1, 1], [], []>} : vector<128x32xf32>, vector<32x32xf32>, vector<128x32xf32> -> vector<128x32xf32>
    %26 = vector.extract_strided_slice %5 {offsets = [0, 96], sizes = [128, 32], strides = [1, 1]} : vector<128x128xf32> to vector<128x32xf32>
    %27 = arith.addf %25, %26 : vector<128x32xf32>
    %cst_18 = arith.constant 0.000000e+00 : f32
    %28 = vector.broadcast %cst_18 : f32 to vector<128x32xf32>
    %29 = arith.maximumf %27, %28 : vector<128x32xf32>
    %30 = tpu.concatenate %8, %15, %22, %29 in 1 : vector<128x32xf32>, vector<128x32xf32>, vector<128x32xf32>, vector<128x32xf32> -> vector<128x128xf32>
    %c0_19 = arith.constant 0 : index
    %c0_20 = arith.constant 0 : index
    %31 = vector.load %arg5[%c0_19, %c0_20] : memref<128x128xf32, #tpu.memory_space<vmem>>, vector<128x128xf32>
    %cst_21 = arith.constant dense<0.000000e+00> : vector<128x128xf32>
    %32 = tpu.matmul %30, %31, %cst_21 {dimension_numbers = #tpu.dot_dimension_numbers<[1], [0], [0], [1], [0, 0, 1, 1], [], []>} : vector<128x128xf32>, vector<128x128xf32>, vector<128x128xf32> -> vector<128x128xf32>
    %c0_22 = arith.constant 0 : index
    %c0_23 = arith.constant 0 : index
    %33 = vector.load %arg6[%c0_22, %c0_23] : memref<1x128xf32, #tpu.memory_space<vmem>>, vector<1x128xf32>
    %34 = vector.broadcast %33 : vector<1x128xf32> to vector<128x128xf32>
    %35 = arith.addf %32, %34 : vector<128x128xf32>
    %cst_24 = arith.constant 0.000000e+00 : f32
    %36 = vector.broadcast %cst_24 : f32 to vector<128x128xf32>
    %37 = arith.maximumf %35, %36 : vector<128x128xf32>
    %c0_25 = arith.constant 0 : index
    %c0_26 = arith.constant 0 : index
    %38 = vector.load %arg7[%c0_25, %c0_26] : memref<128x128xf32, #tpu.memory_space<vmem>>, vector<128x128xf32>
    %cst_27 = arith.constant dense<0.000000e+00> : vector<128x128xf32>
    %39 = tpu.matmul %37, %38, %cst_27 {dimension_numbers = #tpu.dot_dimension_numbers<[1], [0], [0], [1], [0, 0, 1, 1], [], []>} : vector<128x128xf32>, vector<128x128xf32>, vector<128x128xf32> -> vector<128x128xf32>
    %c0_28 = arith.constant 0 : index
    %c0_29 = arith.constant 0 : index
    %40 = vector.load %arg8[%c0_28, %c0_29] : memref<32x128xf32, #tpu.memory_space<vmem>>, vector<32x128xf32>
    %cst_30 = arith.constant dense<0.000000e+00> : vector<128x128xf32>
    %41 = tpu.matmul %29, %40, %cst_30 {dimension_numbers = #tpu.dot_dimension_numbers<[1], [0], [0], [1], [0, 0, 1, 1], [], []>} : vector<128x32xf32>, vector<32x128xf32>, vector<128x128xf32> -> vector<128x128xf32>
    %42 = arith.addf %39, %41 : vector<128x128xf32>
    %c0_31 = arith.constant 0 : index
    %c0_32 = arith.constant 0 : index
    %43 = vector.load %arg9[%c0_31, %c0_32] : memref<1x128xf32, #tpu.memory_space<vmem>>, vector<1x128xf32>
    %44 = vector.broadcast %43 : vector<1x128xf32> to vector<128x128xf32>
    %45 = arith.addf %42, %44 : vector<128x128xf32>
    %46 = arith.negf %45 : vector<128x128xf32>
    %47 = math.exp %46 : vector<128x128xf32>
    %cst_33 = arith.constant 1.000000e+00 : f32
    %48 = vector.broadcast %cst_33 : f32 to vector<128x128xf32>
    %49 = arith.addf %48, %47 : vector<128x128xf32>
    %50 = arith.divf %48, %49 : vector<128x128xf32>
    %c0_34 = arith.constant 0 : index
    %c0_35 = arith.constant 0 : index
    %51 = vector.load %arg10[%c0_34, %c0_35] : memref<128x128xf32, #tpu.memory_space<vmem>>, vector<128x128xf32>
    tpu.vector_store %arg10[%c0_34, %c0_35], %50 {strides = array<i32>} : memref<128x128xf32, #tpu.memory_space<vmem>>, vector<128x128xf32>,
    return
  }
  func.func @transform_0(%arg0: i32) -> (i32, i32) {
    %c0_i32 = arith.constant 0 : i32
    %c0_i32_0 = arith.constant 0 : i32
    return %arg0, %c0_i32 : i32, i32
  }
  func.func @transform_1(%arg0: i32) -> (i32, i32) {
    %c0_i32 = arith.constant 0 : i32
    %c0_i32_0 = arith.constant 0 : i32
    %c0_i32_1 = arith.constant 0 : i32
    return %c0_i32, %c0_i32_0 : i32, i32
  }
  func.func @transform_2(%arg0: i32) -> (i32, i32) {
    %c0_i32 = arith.constant 0 : i32
    %c0_i32_0 = arith.constant 0 : i32
    %c0_i32_1 = arith.constant 0 : i32
    return %c0_i32, %c0_i32_0 : i32, i32
  }
  func.func @transform_3(%arg0: i32) -> (i32, i32, i32) {
    %c0_i32 = arith.constant 0 : i32
    %c0_i32_0 = arith.constant 0 : i32
    %c0_i32_1 = arith.constant 0 : i32
    %c0_i32_2 = arith.constant 0 : i32
    return %c0_i32, %c0_i32_0, %c0_i32_1 : i32, i32, i32
  }
  func.func @transform_4(%arg0: i32) -> (i32, i32) {
    %c0_i32 = arith.constant 0 : i32
    %c0_i32_0 = arith.constant 0 : i32
    %c0_i32_1 = arith.constant 0 : i32
    return %c0_i32, %c0_i32_0 : i32, i32
  }
  func.func @transform_5(%arg0: i32) -> (i32, i32) {
    %c0_i32 = arith.constant 0 : i32
    %c0_i32_0 = arith.constant 0 : i32
    %c0_i32_1 = arith.constant 0 : i32
    return %c0_i32, %c0_i32_0 : i32, i32
  }
  func.func @transform_6(%arg0: i32) -> (i32, i32) {
    %c0_i32 = arith.constant 0 : i32
    %c0_i32_0 = arith.constant 0 : i32
    %c0_i32_1 = arith.constant 0 : i32
    return %c0_i32, %c0_i32_0 : i32, i32
  }
  func.func @transform_7(%arg0: i32) -> (i32, i32) {
    %c0_i32 = arith.constant 0 : i32
    %c0_i32_0 = arith.constant 0 : i32
    %c0_i32_1 = arith.constant 0 : i32
    return %c0_i32, %c0_i32_0 : i32, i32
  }
  func.func @transform_8(%arg0: i32) -> (i32, i32) {
    %c0_i32 = arith.constant 0 : i32
    %c0_i32_0 = arith.constant 0 : i32
    %c0_i32_1 = arith.constant 0 : i32
    return %c0_i32, %c0_i32_0 : i32, i32
  }
  func.func @transform_9(%arg0: i32) -> (i32, i32) {
    %c0_i32 = arith.constant 0 : i32
    %c0_i32_0 = arith.constant 0 : i32
    return %arg0, %c0_i32 : i32, i32
  }
}

</mosaic_0001>

<bundles_post_ra>
// kernel: hmcnf_forward.1
= control target key start
LH: loop header
LB: loop body
LE: loop exit
PB: predicated region body
PF: predicated region fallthrough
CT: control target
= control target key end

     0   :  { %s3265_s30 = smov 0   ;;  %s4011_s0 = inlined_call_operand.vmem [shape: f32[256,167], index: 0, kind: input, shape index: {}]   ;;  %s4012_s1 = inlined_call_operand.vmem [shape: f32[167,128], index: 1, kind: input, shape index: {}]   ;;  %s4013_s2 = inlined_call_operand.vmem [shape: f32[1,128], index: 2, kind: input, shape index: {}]   ;;  %s4014_s3 = inlined_call_operand.vmem [shape: f32[3,32,32], index: 3, kind: input, shape index: {}]   ;;  %s4015_s4 = inlined_call_operand.vmem [shape: f32[128,128], index: 4, kind: input, shape index: {}]   ;;  %s4016_s5 = inlined_call_operand.vmem [shape: f32[1,128], index: 5, kind: input, shape index: {}]   ;;  %s4017_s6 = inlined_call_operand.vmem [shape: f32[128,128], index: 6, kind: input, shape index: {}]   ;;  %s4018_s7 = inlined_call_operand.vmem [shape: f32[32,128], index: 7, kind: input, shape index: {}]   ;;  %s4019_s8 = inlined_call_operand.vmem [shape: f32[1,128], index: 8, kind: input, shape index: {}]   ;;  %s4020_s9 = inlined_call_operand.vmem [shape: f32[256,128], index: 9, kind: output, shape index: {}]  }
   0x1 LB: > { %s2342_s10 = sadd.s32 4294967295, %s3208_s30   ;;  %p2346_p0 = scmp.ge.s32.totalorder %s3208_s30, 1  ;;  %s3208_s30 = sphi %s3265_s30, %s19_s30  }
   0x2   : > { %p289_p1 = scmp.lt.s32.totalorder %s3208_s30, 3 }
   0x4   : > { %p290_p2 = pnand %p2346_p0, %p289_p1 }
   0x5   : > { %v371_v0 = vld [vmem:[%s4012_s1] sm:$0xff] (!%p290_p2)  ;;  %v372_v1 = vld [vmem:[%s4012_s1 + $0x8] sm:$0xff] (!%p290_p2)  ;;  %v373_v2 = vld [vmem:[%s4012_s1 + $0x10] sm:$0xff] (!%p290_p2)  ;;  %v3210_v3 = vmov (!%p290_p2), 0.0|0.0   ;;  %s2347_s19 = sshll.u32 (!%p290_p2), %s2342_s10, 4  ;;  %vm399_vm0 = vcmask (!%p290_p2), 318464  }
   0x6   : > { %293 = sbr.rel (%p290_p2) target bundleno = 1561 (0x619), region = 56  ;;  %2847 = vmatprep.subr.bf16.mxu0 (!%p290_p2), %v3210_v3  ;;  %v2848_v4 = vpack.c.bf16 (!%p290_p2), %v372_v1, %v371_v0  ;;  %v374_v5 = vld [vmem:[%s4012_s1 + $0x18] sm:$0xff] (!%p290_p2)  ;;  %p327_p3 = scmp.lt.s32.totalorder (!%p290_p2), %s2347_s19, 31  ;;  %v375_v7 = vld [vmem:[%s4012_s1 + $0x20] sm:$0xff] (!%p290_p2)  ;;  %v376_v8 = vld [vmem:[%s4012_s1 + $0x28] sm:$0xff] (!%p290_p2)  ;;  %v3211_v32 = vmov (!%p290_p2), 0.0  }
   0x7   : > { %v2851_v6 = vpack.c.bf16 (!%p290_p2), %v374_v5, %v373_v2  ;;  %v2854_v9 = vpack.c.bf16 (!%p290_p2), %v376_v8, %v375_v7  ;;  %v377_v10 = vld [vmem:[%s4012_s1 + $0x30] sm:$0xff] (!%p290_p2)  ;;  %v378_v11 = vld [vmem:[%s4012_s1 + $0x38] sm:$0xff] (!%p290_p2)  ;;  %v379_v14 = vld [vmem:[%s4012_s1 + $0x40] sm:$0xff] (!%p290_p2)  ;;  %vm448_vm1 = vcmask (!%p290_p2), 1046528   ;;  %vm681_vm2 = vcmask (!%p290_p2), 261120   ;;  %s3212_s11 = smov (!%p290_p2), 96  }
   0x8   : > { %2849 = vmatpush1.bf16.msra.mxu0 (!%p290_p2), %v2848_v4  ;;  %v2857_v13 = vpack.c.bf16 (!%p290_p2), %v378_v11, %v377_v10  ;;  %v380_v15 = vld [vmem:[%s4012_s1 + $0x48] sm:$0xff] (!%p290_p2)  ;;  %v381_v17 = vld [vmem:[%s4012_s1 + $0x50] sm:$0xff] (!%p290_p2)  ;;  %v382_v18 = vld [vmem:[%s4012_s1 + $0x58] sm:$0xff] (!%p290_p2)  ;;  %s3213_s12 = smov (!%p290_p2), 64   ;;  %s3214_s22 = smov (!%p290_p2), 32   ;;  %vm1591_vm3 = vcmask (!%p290_p2), 523264  }
   0x9   : > { %2850 = vmatprep.subr.bf16.mxu0 (!%p290_p2), %v3210_v3  ;;  %v2860_v16 = vpack.c.bf16 (!%p290_p2), %v380_v15, %v379_v14  ;;  %v2863_v19 = vpack.c.bf16 (!%p290_p2), %v382_v18, %v381_v17  ;;  %v383_v20 = vld [vmem:[%s4012_s1 + $0x60] sm:$0xff] (!%p290_p2)  ;;  %v384_v21 = vld [vmem:[%s4012_s1 + $0x68] sm:$0xff] (!%p290_p2)  ;;  %v385_v23 = vld [vmem:[%s4012_s1 + $0x70] sm:$0xff] (!%p290_p2)  ;;  %vm1608_vm4 = vcmask (!%p290_p2), 785408  }
   0xa   : > { %v2866_v22 = vpack.c.bf16 (!%p290_p2), %v384_v21, %v383_v20  ;;  %v386_v24 = vld [vmem:[%s4012_s1 + $0x78] sm:$0xff] (!%p290_p2)  ;;  %v387_v26 = vld [vmem:[%s4012_s1 + $0x80] sm:$0xff] (!%p290_p2)  ;;  %v388_v27 = vld [vmem:[%s4012_s1 + $0x88] sm:$0xff] (!%p290_p2) }
   0xb   : > { %v2869_v25 = vpack.c.bf16 (!%p290_p2), %v386_v24, %v385_v23  ;;  %v2872_v28 = vpack.c.bf16 (!%p290_p2), %v388_v27, %v387_v26  ;;  %v389_v29 = vld [vmem:[%s4012_s1 + $0x90] sm:$0xff] (!%p290_p2)  ;;  %v390_v30 = vld [vmem:[%s4012_s1 + $0x98] sm:$0xff] (!%p290_p2)  ;;  %v391_v33 = vld [vmem:[%s4012_s1 + $0xa0] sm:$0x7f] (!%p290_p2) }
   0xc   : > { %2852 = vmatpush1.bf16.msra.mxu0 (!%p290_p2), %v2851_v6  ;;  %v2875_v31 = vpack.c.bf16 (!%p290_p2), %v390_v30, %v389_v29  ;;  %v613_v1 = vld [vmem:[%s4014_s3] sm:$0xff] (!%p290_p2)  ;;  %v614_v2 = vld [vmem:[%s4014_s3 + $0x8] sm:$0xff] (!%p290_p2)  ;;  %v615_v4 = vld [vmem:[%s4014_s3 + $0x10] sm:$0xff] (!%p290_p2) }
   0xd   : > { %s4022_s19 = smov (!%p327_p3, %s2347_s19), 31  ;;  %2853 = vmatprep.subr.bf16.mxu0 %v3210_v3  ;;  %v616_v5 = vld [vmem:[%s4014_s3 + $0x18] sm:$0xff]  ;;  %v3407_v7 = vld [vmem:[%s4013_s2] ss:$0 sm:$0xff] }
   0xe   : > { %s2462_s24 = sshll.u32 %s4022_s19, 4  ;;  %v2881_v6 = vpack.c.bf16 %v616_v5, %v615_v4  ;;  %s2351_s20 = sshll.u32 %s4022_s19, 3 }
   0xf   : > { %s3297_s27 = scalar_lea.vmem %s4011_s0, %s2462_s24 }
  0x10   : > { %v340_v12 = vld [vmem:[%s3297_s27 + $0x8] sm:$0xff]  ;;  %2855 = vmatpush1.bf16.msra.mxu0 %v2854_v9  ;;  %v339_v34 = vld [vmem:[%s3297_s27] sm:$0xff]  ;;  %v342_v35 = vld [vmem:[%s3297_s27 + $0x18] sm:$0xff] }
  0x11   : > { %2354 = vmatprep.mubr.msk.f32.mxu0 %vm399_vm0, %v340_v12  ;;  %2856 = vmatprep.subr.bf16.mxu0 %v3210_v3  ;;  %v341_v36 = vld [vmem:[%s3297_s27 + $0x10] sm:$0xff]  ;;  %v344_v37 = vld [vmem:[%s3297_s27 + $0x28] sm:$0xff]  ;;  %v343_v38 = vld [vmem:[%s3297_s27 + $0x20] sm:$0xff] }
  0x12   : > { %v346_v39 = vld [vmem:[%s3297_s27 + $0x38] sm:$0xff]  ;;  %v345_v40 = vld [vmem:[%s3297_s27 + $0x30] sm:$0xff]  ;;  %v348_v41 = vld [vmem:[%s3297_s27 + $0x48] sm:$0xff] }
  0x13   : > { %v347_v42 = vld [vmem:[%s3297_s27 + $0x40] sm:$0xff]  ;;  %v350_v43 = vld [vmem:[%s3297_s27 + $0x58] sm:$0xff]  ;;  %v349_v44 = vld [vmem:[%s3297_s27 + $0x50] sm:$0xff] }
  0x14   : > { %2858 = vmatpush1.bf16.msra.mxu0 %v2857_v13  ;;  %v352_v45 = vld [vmem:[%s3297_s27 + $0x68] sm:$0xff]  ;;  %v351_v46 = vld [vmem:[%s3297_s27 + $0x60] sm:$0xff]  ;;  %v354_v47 = vld [vmem:[%s3297_s27 + $0x78] sm:$0xff] }
  0x15   : > { %2859 = vmatprep.subr.bf16.mxu0 %v3210_v3  ;;  %v353_v48 = vld [vmem:[%s3297_s27 + $0x70] sm:$0xff]  ;;  %v356_v49 = vld [vmem:[%s3297_s27 + $0x88] sm:$0xff]  ;;  %v355_v50 = vld [vmem:[%s3297_s27 + $0x80] sm:$0xff] }
  0x16   : > { %v358_v51 = vld [vmem:[%s3297_s27 + $0x98] sm:$0xff]  ;;  %v357_v52 = vld [vmem:[%s3297_s27 + $0x90] sm:$0xff]  ;;  %v360_v53 = vld [vmem:[%s3297_s27 + $0xa8] sm:$0xff] }
  0x17   : > { %v359_v54 = vld [vmem:[%s3297_s27 + $0xa0] sm:$0xff]  ;;  %v362_v55 = vld [vmem:[%s3297_s27 + $0xb8] sm:$0xff]  ;;  %v361_v56 = vld [vmem:[%s3297_s27 + $0xb0] sm:$0xff] }
  0x18   : > { %2861 = vmatpush1.bf16.msra.mxu0 %v2860_v16  ;;  %v364_v57 = vld [vmem:[%s3297_s27 + $0xc8] sm:$0xff]  ;;  %v363_v58 = vld [vmem:[%s3297_s27 + $0xc0] sm:$0xff]  ;;  %v366_v59 = vld [vmem:[%s3297_s27 + $0xd8] sm:$0xff] }
  0x19   : > { %2862 = vmatprep.subr.bf16.mxu0 %v3210_v3  ;;  %v365_v60 = vld [vmem:[%s3297_s27 + $0xd0] sm:$0xff]  ;;  %v368_v61 = vld [vmem:[%s3297_s27 + $0xe8] sm:$0xff]  ;;  %v367_v62 = vld [vmem:[%s3297_s27 + $0xe0] sm:$0xff] }
  0x1a   : > { %v370_v63 = vld [vmem:[%s3297_s27 + $0xf8] sm:$0xff]  ;;  %v369_v0 = vld [vmem:[%s3297_s27 + $0xf0] sm:$0xff] }
  0x1c   : > { %2864 = vmatpush1.bf16.msra.mxu0 %v2863_v19 }
  0x1d   : > { %2865 = vmatprep.subr.bf16.mxu0 %v3210_v3 }
  0x20   : > { %2867 = vmatpush1.bf16.msra.mxu0 %v2866_v22 }
  0x21   : > { %2868 = vmatprep.subr.bf16.mxu0 %v3210_v3 }
  0x24   : > { %2870 = vmatpush1.bf16.msra.mxu0 %v2869_v25 }
  0x25   : > { %2871 = vmatprep.subr.bf16.mxu0 %v3210_v3 }
  0x28   : > { %2873 = vmatpush1.bf16.msra.mxu0 %v2872_v28 }
  0x29   : > { %2874 = vmatprep.subr.bf16.mxu0 %v3210_v3  ;;  %v2877_v3 = vpack.c.bf16 %v614_v2, %v613_v1 }
  0x2b   : > { %2878 = vmatprep.subr.bf16.mxu1 %v2877_v3 }
  0x2c   : > { %2876 = vmatpush1.bf16.msra.mxu0 %v2875_v31  ;;  %2880 = vmatpush3.bf16.msra.mxu1 %v2877_v3 }
  0x2d   : > { %492 = vmatprep.subr.mxu0 %v3211_v32  ;;  %2882 = vmatprep.subr.bf16.mxu1 %v2881_v6 }
  0x30   : > { %2353 = vmatpush1.msk.msra.mxu0 %vm448_vm1, %v391_v33  ;;  %2884 = vmatpush3.bf16.msra.mxu1 %v2881_v6 }
  0x31   : > { %517 = vmatmul.mubr.f32.vlgmr.msra.gmra.mrb[0].mxu0 %v339_v34 }
  0x32   : > { %2355 = vmatprep.mubr.msk.f32.mxu0 %vm399_vm0, %v342_v35 }
  0x35   : > { %522 = vmatmul.mubr.f32.gmra.mrb[2].mxu0 %v341_v36 }
  0x36   : > { %2356 = vmatprep.mubr.msk.f32.mxu0 %vm399_vm0, %v344_v37 }
  0x39   : > { %527 = vmatmul.mubr.f32.gmra.mrb[4].mxu0 %v343_v38 }
  0x3a   : > { %2357 = vmatprep.mubr.msk.f32.mxu0 %vm399_vm0, %v346_v39 }
  0x3d   : > { %532 = vmatmul.mubr.f32.gmra.mrb[6].mxu0 %v345_v40 }
  0x3e   : > { %2358 = vmatprep.mubr.msk.f32.mxu0 %vm399_vm0, %v348_v41 }
  0x41   : > { %537 = vmatmul.mubr.f32.gmra.mrb[8].mxu0 %v347_v42 }
  0x42   : > { %2359 = vmatprep.mubr.msk.f32.mxu0 %vm399_vm0, %v350_v43 }
  0x45   : > { %542 = vmatmul.mubr.f32.gmra.mrb[10].mxu0 %v349_v44 }
  0x46   : > { %2360 = vmatprep.mubr.msk.f32.mxu0 %vm399_vm0, %v352_v45 }
  0x49   : > { %547 = vmatmul.mubr.f32.gmra.mrb[12].mxu0 %v351_v46 }
  0x4a   : > { %2361 = vmatprep.mubr.msk.f32.mxu0 %vm399_vm0, %v354_v47 }
  0x4d   : > { %552 = vmatmul.mubr.f32.gmra.mrb[14].mxu0 %v353_v48 }
  0x4e   : > { %2362 = vmatprep.mubr.msk.f32.mxu0 %vm399_vm0, %v356_v49 }
  0x51   : > { %557 = vmatmul.mubr.f32.gmra.mrb[16].mxu0 %v355_v50 }
  0x52   : > { %2363 = vmatprep.mubr.msk.f32.mxu0 %vm399_vm0, %v358_v51 }
  0x55   : > { %562 = vmatmul.mubr.f32.gmra.mrb[18].mxu0 %v357_v52 }
  0x56   : > { %2364 = vmatprep.mubr.msk.f32.mxu0 %vm399_vm0, %v360_v53 }
  0x59   : > { %567 = vmatmul.mubr.f32.gmra.mrb[20].mxu0 %v359_v54 }
  0x5a   : > { %2365 = vmatprep.mubr.msk.f32.mxu0 %vm399_vm0, %v362_v55 }
  0x5d   : > { %572 = vmatmul.mubr.f32.gmra.mrb[22].mxu0 %v361_v56 }
  0x5e   : > { %2366 = vmatprep.mubr.msk.f32.mxu0 %vm399_vm0, %v364_v57 }
  0x61   : > { %577 = vmatmul.mubr.f32.gmra.mrb[24].mxu0 %v363_v58 }
  0x62   : > { %2367 = vmatprep.mubr.msk.f32.mxu0 %vm399_vm0, %v366_v59 }
  0x65   : > { %582 = vmatmul.mubr.f32.gmra.mrb[26].mxu0 %v365_v60 }
  0x66   : > { %2368 = vmatprep.mubr.msk.f32.mxu0 %vm399_vm0, %v368_v61 }
  0x69   : > { %587 = vmatmul.mubr.f32.gmra.mrb[28].mxu0 %v367_v62 }
  0x6a   : > { %2369 = vmatprep.mubr.msk.f32.mxu0 %vm399_vm0, %v370_v63 }
  0x6d   : > { %592 = vmatmul.mubr.f32.gmra.mrb[30].mxu0 %v369_v0 }
 0x104   : > { %v518_v8 = vpop.f32.mrb[0].mxu0 }
 0x105   : > { %v3410_v9 = vadd.f32 %v3407_v7, %v518_v8  ;;  %v520_v10 = vpop.f32.mrb[1].mxu0 }
 0x106   : > { %v2387_v10 = vld [vmem:[%s4014_s3 + $0x28] sm:$0xff] }
 0x107   : > { %633 = vrot.lane.b32.xlu0 %v3410_v9, %s3212_s11  ;;  %v597_v11 = vmax.f32 %v3410_v9, 0.0 }
 0x108   : > { %v523_v12 = vpop.f32.mrb[2].mxu0 }
 0x109   : > { %v3416_v13 = vadd.f32 %v3407_v7, %v523_v12  ;;  %v525_v14 = vpop.f32.mrb[3].mxu0  ;;  %2615 = vmatprep.mubr.msk.f32.mxu1 %vm681_vm2, %v597_v11 }
 0x10a   : > { %v2388_v14 = vld [vmem:[%s4014_s3 + $0x30] sm:$0xff] }
 0x10b   : > { %635 = vrot.lane.b32.xlu0 %v3416_v13, %s3212_s11  ;;  %v598_v15 = vmax.f32 %v3416_v13, 0.0 }
 0x10c   : > { %v528_v16 = vpop.f32.mrb[4].mxu0 }
 0x10d   : > { %v3425_v17 = vadd.f32 %v3407_v7, %v528_v16  ;;  %v530_v18 = vpop.f32.mrb[5].mxu0  ;;  %2616 = vmatmul.mubr.msk.f32.vlgmr.msra.gmra.mrb[0].mxu1 %vm681_vm2, %v598_v15  ;;  %v2389_v16 = vld [vmem:[%s4014_s3 + $0x38] sm:$0xff] }
 0x10e   : > { %v2889_v18 = vpack.c.bf16 %v2389_v16, %v2388_v14 }
 0x10f   : > { %637 = vrot.lane.b32.xlu1 %v3425_v17, %s3212_s11  ;;  %v599_v19 = vmax.f32 %v3425_v17, 0.0 }
 0x110   : > { %v533_v20 = vpop.f32.mrb[6].mxu0 }
 0x111   : > { %v3434_v21 = vadd.f32 %v3407_v7, %v533_v20  ;;  %v535_v22 = vpop.f32.mrb[7].mxu0  ;;  %2618 = vmatprep.mubr.msk.f32.mxu1 %vm681_vm2, %v599_v19 }
 0x113   : > { %639 = vrot.lane.b32.xlu1 %v3434_v21, %s3212_s11  ;;  %v600_v23 = vmax.f32 %v3434_v21, 0.0 }
 0x114   : > { %v538_v24 = vpop.f32.mrb[8].mxu0 }
 0x115   : > { %v3443_v25 = vadd.f32 %v3407_v7, %v538_v24  ;;  %v540_v26 = vpop.f32.mrb[9].mxu0  ;;  %2619 = vmatmul.mubr.msk.f32.gmra.mrb[2].mxu1 %vm681_vm2, %v600_v23 }
 0x117   : > { %641 = vrot.lane.b32.xlu0 %v3443_v25, %s3212_s11  ;;  %v601_v27 = vmax.f32 %v3443_v25, 0.0 }
 0x118   : > { %v543_v28 = vpop.f32.mrb[10].mxu0 }
 0x119   : > { %v3452_v29 = vadd.f32 %v3407_v7, %v543_v28  ;;  %v545_v30 = vpop.f32.mrb[11].mxu0  ;;  %2621 = vmatprep.mubr.msk.f32.mxu1 %vm681_vm2, %v601_v27 }
 0x11b   : > { %643 = vrot.lane.b32.xlu1 %v3452_v29, %s3212_s11  ;;  %v602_v31 = vmax.f32 %v3452_v29, 0.0 }
 0x11c   : > { %v548_v32 = vpop.f32.mrb[12].mxu0 }
 0x11d   : > { %v3461_v33 = vadd.f32 %v3407_v7, %v548_v32  ;;  %v550_v34 = vpop.f32.mrb[13].mxu0  ;;  %2622 = vmatmul.mubr.msk.f32.gmra.mrb[4].mxu1 %vm681_vm2, %v602_v31 }
 0x11f   : > { %645 = vrot.lane.b32.xlu0 %v3461_v33, %s3212_s11  ;;  %v603_v35 = vmax.f32 %v3461_v33, 0.0 }
 0x120   : > { %v553_v36 = vpop.f32.mrb[14].mxu0 }
 0x121   : > { %v3470_v37 = vadd.f32 %v3407_v7, %v553_v36  ;;  %v555_v38 = vpop.f32.mrb[15].mxu0  ;;  %2624 = vmatprep.mubr.msk.f32.mxu1 %vm681_vm2, %v603_v35 }
 0x123   : > { %647 = vrot.lane.b32.xlu1 %v3470_v37, %s3212_s11  ;;  %v604_v39 = vmax.f32 %v3470_v37, 0.0 }
 0x124   : > { %v558_v40 = vpop.f32.mrb[16].mxu0 }
 0x125   : > { %v3479_v41 = vadd.f32 %v3407_v7, %v558_v40  ;;  %v560_v42 = vpop.f32.mrb[17].mxu0  ;;  %2625 = vmatmul.mubr.msk.f32.gmra.mrb[6].mxu1 %vm681_vm2, %v604_v39 }
 0x127   : > { %649 = vrot.lane.b32.xlu0 %v3479_v41, %s3212_s11  ;;  %v605_v43 = vmax.f32 %v3479_v41, 0.0 }
 0x128   : > { %v563_v44 = vpop.f32.mrb[18].mxu0 }
 0x129   : > { %v3488_v45 = vadd.f32 %v3407_v7, %v563_v44  ;;  %v565_v46 = vpop.f32.mrb[19].mxu0  ;;  %2627 = vmatprep.mubr.msk.f32.mxu1 %vm681_vm2, %v605_v43 }
 0x12b   : > { %651 = vrot.lane.b32.xlu1 %v3488_v45, %s3212_s11  ;;  %v606_v47 = vmax.f32 %v3488_v45, 0.0 }
 0x12c   : > { %v568_v48 = vpop.f32.mrb[20].mxu0 }
 0x12d   : > { %v3497_v49 = vadd.f32 %v3407_v7, %v568_v48  ;;  %v570_v50 = vpop.f32.mrb[21].mxu0  ;;  %2628 = vmatmul.mubr.msk.f32.gmra.mrb[8].mxu1 %vm681_vm2, %v606_v47 }
 0x12f   : > { %653 = vrot.lane.b32.xlu0 %v3497_v49, %s3212_s11  ;;  %v607_v51 = vmax.f32 %v3497_v49, 0.0 }
 0x130   : > { %v573_v52 = vpop.f32.mrb[22].mxu0 }
 0x131   : > { %v3506_v53 = vadd.f32 %v3407_v7, %v573_v52  ;;  %v575_v54 = vpop.f32.mrb[23].mxu0  ;;  %2630 = vmatprep.mubr.msk.f32.mxu1 %vm681_vm2, %v607_v51 }
 0x133   : > { %655 = vrot.lane.b32.xlu1 %v3506_v53, %s3212_s11  ;;  %v608_v55 = vmax.f32 %v3506_v53, 0.0 }
 0x134   : > { %v578_v56 = vpop.f32.mrb[24].mxu0 }
 0x135   : > { %v3515_v57 = vadd.f32 %v3407_v7, %v578_v56  ;;  %v580_v58 = vpop.f32.mrb[25].mxu0  ;;  %2631 = vmatmul.mubr.msk.f32.gmra.mrb[10].mxu1 %vm681_vm2, %v608_v55 }
 0x137   : > { %657 = vrot.lane.b32.xlu0 %v3515_v57, %s3212_s11  ;;  %v609_v59 = vmax.f32 %v3515_v57, 0.0 }
 0x138   : > { %v583_v60 = vpop.f32.mrb[26].mxu0 }
 0x139   : > { %v3524_v61 = vadd.f32 %v3407_v7, %v583_v60  ;;  %v585_v62 = vpop.f32.mrb[27].mxu0  ;;  %2633 = vmatprep.mubr.msk.f32.mxu1 %vm681_vm2, %v609_v59 }
 0x13b   : > { %659 = vrot.lane.b32.xlu1 %v3524_v61, %s3212_s11  ;;  %v610_v63 = vmax.f32 %v3524_v61, 0.0 }
 0x13c   : > { %v588_v0 = vpop.f32.mrb[28].mxu0 }
 0x13d   : > { %v3533_v1 = vadd.f32 %v3407_v7, %v588_v0  ;;  %v590_v2 = vpop.f32.mrb[29].mxu0  ;;  %2634 = vmatmul.mubr.msk.f32.gmra.mrb[12].mxu1 %vm681_vm2, %v610_v63 }
 0x13f   : > { %661 = vrot.lane.b32.xlu0 %v3533_v1, %s3212_s11  ;;  %v611_v3 = vmax.f32 %v3533_v1, 0.0 }
 0x140   : > { %v593_v4 = vpop.f32.mrb[30].mxu0 }
 0x141   : > { %v3542_v5 = vadd.f32 %v3407_v7, %v593_v4  ;;  %v595_v6 = vpop.f32.mrb[31].mxu0  ;;  %2636 = vmatprep.mubr.msk.f32.mxu1 %vm681_vm2, %v611_v3  ;;  %v2386_v7 = vld [vmem:[%s4014_s3 + $0x20] sm:$0xff] }
 0x142   : > { %v2885_v12 = vpack.c.bf16 %v2387_v10, %v2386_v7  ;;  %v2406_v6 = vld [vmem:[%s4014_s3 + $0x40] sm:$0xff]  ;;  %v2407_v7 = vld [vmem:[%s4014_s3 + $0x48] sm:$0xff] }
 0x143   : > { %663 = vrot.lane.b32.xlu1 %v3542_v5, %s3212_s11  ;;  %896 = vrot.lane.b32.xlu0 %v3410_v9, %s3213_s12  ;;  %v612_v8 = vmax.f32 %v3542_v5, 0.0  ;;  %v2893_v10 = vpack.c.bf16 %v2407_v7, %v2406_v6 }
 0x144   : > { %2886 = vmatprep.subr.bf16.mxu1 %v2885_v12 }
 0x145   : > { %2637 = vmatmul.mubr.msk.f32.gmra.mrb[14].mxu1 %vm681_vm2, %v612_v8 }
 0x146   : > { %2888 = vmatpush3.bf16.msra.mxu1 %v2885_v12 }
 0x147   : > { %898 = vrot.lane.b32.xlu1 %v3416_v13, %s3213_s12  ;;  %900 = vrot.lane.b32.xlu0 %v3425_v17, %s3213_s12 }
 0x148   : > { %2890 = vmatprep.subr.bf16.mxu1 %v2889_v18 }
 0x14a   : > { %2892 = vmatpush3.bf16.msra.mxu1 %v2889_v18 }
 0x14b   : > { %902 = vrot.lane.b32.xlu1 %v3434_v21, %s3213_s12  ;;  %904 = vrot.lane.b32.xlu0 %v3443_v25, %s3213_s12 }
 0x14c   : > { %2894 = vmatprep.subr.bf16.mxu1 %v2893_v10 }
 0x14f   : > { %906 = vrot.lane.b32.xlu1 %v3452_v29, %s3213_s12  ;;  %908 = vrot.lane.b32.xlu0 %v3461_v33, %s3213_s12 }
 0x153   : > { %910 = vrot.lane.b32.xlu1 %v3470_v37, %s3213_s12  ;;  %912 = vrot.lane.b32.xlu0 %v3479_v41, %s3213_s12 }
 0x157   : > { %914 = vrot.lane.b32.xlu1 %v3488_v45, %s3213_s12  ;;  %916 = vrot.lane.b32.xlu0 %v3497_v49, %s3213_s12 }
 0x15b   : > { %918 = vrot.lane.b32.xlu1 %v3506_v53, %s3213_s12  ;;  %920 = vrot.lane.b32.xlu0 %v3515_v57, %s3213_s12 }
 0x15f   : > { %922 = vrot.lane.b32.xlu1 %v3524_v61, %s3213_s12  ;;  %924 = vrot.lane.b32.xlu0 %v3533_v1, %s3213_s12 }
 0x163   : > { %926 = vrot.lane.b32.xlu1 %v3542_v5, %s3213_s12  ;;  %1158 = vrot.lane.b32.xlu0 %v3410_v9, %s3214_s22 }
 0x167   : > { %1160 = vrot.lane.b32.xlu1 %v3416_v13, %s3214_s22  ;;  %1162 = vrot.lane.b32.xlu0 %v3425_v17, %s3214_s22 }
 0x16b   : > { %1164 = vrot.lane.b32.xlu1 %v3434_v21, %s3214_s22  ;;  %1166 = vrot.lane.b32.xlu0 %v3443_v25, %s3214_s22 }
 0x16f   : > { %1168 = vrot.lane.b32.xlu1 %v3452_v29, %s3214_s22  ;;  %1170 = vrot.lane.b32.xlu0 %v3461_v33, %s3214_s22 }
 0x173   : > { %1172 = vrot.lane.b32.xlu1 %v3470_v37, %s3214_s22  ;;  %1174 = vrot.lane.b32.xlu0 %v3479_v41, %s3214_s22 }
 0x177   : > { %1176 = vrot.lane.b32.xlu1 %v3488_v45, %s3214_s22  ;;  %1178 = vrot.lane.b32.xlu0 %v3497_v49, %s3214_s22  ;;  %v1821_v49 = vld [vmem:[%s4017_s6 + $0x60] sm:$0xff] }
 0x179   : > { %v634_v20 = vpop.permute.xlu0 %633 }
 0x17b   : > { %1180 = vrot.lane.b32.xlu1 %v3506_v53, %s3214_s22  ;;  %1182 = vrot.lane.b32.xlu0 %v3515_v57, %s3214_s22 }
 0x17d   : > { %v636_v22 = vpop.permute.xlu0 %635 }
 0x17f   : > { %1184 = vrot.lane.b32.xlu1 %v3524_v61, %s3214_s22  ;;  %1186 = vrot.lane.b32.xlu0 %v3533_v1, %s3214_s22  ;;  %v1823_v1 = vld [vmem:[%s4017_s6 + $0x70] sm:$0xff] }
 0x181   : > { %v638_v28 = vpop.permute.xlu1 %637 }
 0x183   : > { %1188 = vrot.lane.b32.xlu1 %v3542_v5, %s3214_s22 }
 0x185   : > { %v640_v40 = vpop.permute.xlu1 %639 }
 0x189   : > { %v642_v62 = vpop.permute.xlu0 %641 }
 0x18d   : > { %v644_v56 = vpop.permute.xlu1 %643 }
 0x195   : > { %v648_v16 = vpop.permute.xlu1 %647 }
 0x1e0   : > { %v2617_v24 = vpop.f32.mrb[0].mxu1 }
 0x1e1   : > { %v802_v26 = vadd.f32 %v2617_v24, %v636_v22  ;;  %v796_v30 = vpop.f32.mrb[1].mxu1 }
 0x1e2   : > { %v797_v34 = vadd.f32 %v796_v30, %v634_v20  ;;  %v646_v20 = vpop.permute.xlu0 %645 }
 0x1e3   : > { %v876_v32 = vmax.f32 %v802_v26, 0.0 }
 0x1e4   : > { %v875_v36 = vmax.f32 %v797_v34, 0.0  ;;  %v652_v34 = vpop.permute.xlu1 %651 }
 0x1e6   : > { %v3018_v38 = vpack.i.bf16 %v876_v32, %v875_v36  ;;  %2647 = vmatprep.mubr.msk.f32.mxu1 %vm681_vm2, %v875_v36 }
 0x1e7   : > { %2648 = vmatmul.mubr.msk.f32.vlgmr.msra.gmra.mrb[16].mxu1 %vm681_vm2, %v876_v32 }
 0x1e8   : > { %v2620_v42 = vpop.f32.mrb[2].mxu1  ;;  %3019 = vrot.lane.b32.xlu0 %v3018_v38, %s3214_s22  ;;  %2896 = vmatpush3.bf16.msra.mxu1 %v2893_v10  ;;  %v650_v38 = vpop.permute.xlu0 %649 }
 0x1e9   : > { %v812_v44 = vadd.f32 %v2620_v42, %v640_v40  ;;  %v806_v46 = vpop.f32.mrb[3].mxu1 }
 0x1ea   : > { %v807_v50 = vadd.f32 %v806_v46, %v638_v28 }
 0x1eb   : > { %v878_v48 = vmax.f32 %v812_v44, 0.0 }
 0x1ec   : > { %v877_v52 = vmax.f32 %v807_v50, 0.0 }
 0x1ee   : > { %v3023_v54 = vpack.i.bf16 %v878_v48, %v877_v52  ;;  %2650 = vmatprep.mubr.msk.f32.mxu1 %vm681_vm2, %v877_v52  ;;  %v656_v52 = vpop.permute.xlu1 %655 }
 0x1ef   : > { %2651 = vmatmul.mubr.msk.f32.gmra.mrb[18].mxu1 %vm681_vm2, %v878_v48 }
 0x1f0   : > { %v2623_v58 = vpop.f32.mrb[4].mxu1  ;;  %3024 = vrot.lane.b32.xlu1 %v3023_v54, %s3214_s22 }
 0x1f1   : > { %v822_v60 = vadd.f32 %v2623_v58, %v644_v56  ;;  %v816_v0 = vpop.f32.mrb[5].mxu1  ;;  %v654_v56 = vpop.permute.xlu0 %653 }
 0x1f2   : > { %v817_v4 = vadd.f32 %v816_v0, %v642_v62  ;;  %v660_v6 = vpop.permute.xlu1 %659 }
 0x1f3   : > { %v880_v2 = vmax.f32 %v822_v60, 0.0 }
 0x1f4   : > { %v879_v12 = vmax.f32 %v817_v4, 0.0 }
 0x1f5   : > { %v658_v10 = vpop.permute.xlu0 %657 }
 0x1f6   : > { %v3028_v14 = vpack.i.bf16 %v880_v2, %v879_v12  ;;  %2653 = vmatprep.mubr.msk.f32.mxu1 %vm681_vm2, %v879_v12 }
 0x1f7   : > { %2654 = vmatmul.mubr.msk.f32.gmra.mrb[20].mxu1 %vm681_vm2, %v880_v2 }
 0x1f8   : > { %v2626_v18 = vpop.f32.mrb[6].mxu1  ;;  %3029 = vrot.lane.b32.xlu0 %v3028_v14, %s3214_s22 }
 0x1f9   : > { %v832_v22 = vadd.f32 %v2626_v18, %v648_v16  ;;  %v826_v24 = vpop.f32.mrb[7].mxu1 }
 0x1fa   : > { %v827_v26 = vadd.f32 %v826_v24, %v646_v20  ;;  %v664_v24 = vpop.permute.xlu1 %663 }
 0x1fb   : > { %v882_v28 = vmax.f32 %v832_v22, 0.0 }
 0x1fc   : > { %v881_v30 = vmax.f32 %v827_v26, 0.0 }
 0x1fe   : > { %v3033_v32 = vpack.i.bf16 %v882_v28, %v881_v30  ;;  %2656 = vmatprep.mubr.msk.f32.mxu1 %vm681_vm2, %v881_v30 }
 0x1ff   : > { %2657 = vmatmul.mubr.msk.f32.gmra.mrb[22].mxu1 %vm681_vm2, %v882_v28  ;;  %v662_v28 = vpop.permute.xlu0 %661 }
 0x200   : > { %v2629_v36 = vpop.f32.mrb[8].mxu1  ;;  %3034 = vrot.lane.b32.xlu1 %v3033_v32, %s3214_s22 }
 0x201   : > { %v842_v40 = vadd.f32 %v2629_v36, %v652_v34  ;;  %v836_v42 = vpop.f32.mrb[9].mxu1 }
 0x202   : > { %v837_v44 = vadd.f32 %v836_v42, %v650_v38  ;;  %v2408_v42 = vld [vmem:[%s4014_s3 + $0x50] sm:$0xff] }
 0x203   : > { %v884_v46 = vmax.f32 %v842_v40, 0.0 }
 0x204   : > { %v883_v48 = vmax.f32 %v837_v44, 0.0  ;;  %v2409_v44 = vld [vmem:[%s4014_s3 + $0x58] sm:$0xff] }
 0x206   : > { %v3647_v50 = vpack.i.bf16 %v884_v46, %v883_v48  ;;  %2659 = vmatprep.mubr.msk.f32.mxu1 %vm681_vm2, %v883_v48  ;;  %v899_v48 = vpop.permute.xlu1 %898 }
 0x207   : > { %2660 = vmatmul.mubr.msk.f32.gmra.mrb[24].mxu1 %vm681_vm2, %v884_v46  ;;  %v2897_v46 = vpack.c.bf16 %v2409_v44, %v2408_v42 }
 0x208   : > { %v2632_v54 = vpop.f32.mrb[10].mxu1 }
 0x209   : > { %v852_v58 = vadd.f32 %v2632_v54, %v656_v52  ;;  %v846_v60 = vpop.f32.mrb[11].mxu1  ;;  %2898 = vmatprep.subr.bf16.mxu1 %v2897_v46  ;;  %v897_v54 = vpop.permute.xlu0 %896 }
 0x20a   : > { %v847_v62 = vadd.f32 %v846_v60, %v654_v56  ;;  %2900 = vmatpush3.bf16.msra.mxu1 %v2897_v46 }
 0x20b   : > { %v886_v0 = vmax.f32 %v852_v58, 0.0 }
 0x20c   : > { %v885_v2 = vmax.f32 %v847_v62, 0.0 }
 0x20e   : > { %v3651_v4 = vpack.i.bf16 %v886_v0, %v885_v2  ;;  %2662 = vmatprep.mubr.msk.f32.mxu1 %vm681_vm2, %v885_v2 }
 0x20f   : > { %2663 = vmatmul.mubr.msk.f32.gmra.mrb[26].mxu1 %vm681_vm2, %v886_v0 }
 0x210   : > { %v2635_v7 = vpop.f32.mrb[12].mxu1 }
 0x211   : > { %v862_v12 = vadd.f32 %v2635_v7, %v660_v6  ;;  %v856_v14 = vpop.f32.mrb[13].mxu1  ;;  %v903_v6 = vpop.permute.xlu1 %902 }
 0x212   : > { %v857_v16 = vadd.f32 %v856_v14, %v658_v10  ;;  %v901_v10 = vpop.permute.xlu0 %900 }
 0x213   : > { %v888_v18 = vmax.f32 %v862_v12, 0.0 }
 0x214   : > { %v887_v20 = vmax.f32 %v857_v16, 0.0 }
 0x216   : > { %v3655_v22 = vpack.i.bf16 %v888_v18, %v887_v20  ;;  %2665 = vmatprep.mubr.msk.f32.mxu1 %vm681_vm2, %v887_v20 }
 0x217   : > { %2666 = vmatmul.mubr.msk.f32.gmra.mrb[28].mxu1 %vm681_vm2, %v888_v18 }
 0x218   : > { %v2638_v26 = vpop.f32.mrb[14].mxu1 }
 0x219   : > { %v872_v30 = vadd.f32 %v2638_v26, %v664_v24  ;;  %v866_v32 = vpop.f32.mrb[15].mxu1  ;;  %v907_v26 = vpop.permute.xlu1 %906 }
 0x21a   : > { %v867_v34 = vadd.f32 %v866_v32, %v662_v28 }
 0x21b   : > { %v890_v36 = vmax.f32 %v872_v30, 0.0  ;;  %v905_v30 = vpop.permute.xlu0 %904 }
 0x21c   : > { %v889_v38 = vmax.f32 %v867_v34, 0.0 }
 0x21d   : > { %v911_v46 = vpop.permute.xlu1 %910 }
 0x21e   : > { %v3659_v40 = vpack.i.bf16 %v890_v36, %v889_v38  ;;  %2668 = vmatprep.mubr.msk.f32.mxu1 %vm681_vm2, %v889_v38 }
 0x21f   : > { %2669 = vmatmul.mubr.msk.f32.gmra.mrb[30].mxu1 %vm681_vm2, %v890_v36 }
 0x2ba   : > { %v2649_v52 = vpop.f32.mrb[16].mxu1 }
 0x2bb   : > { %v1064_v56 = vadd.f32 %v2649_v52, %v899_v48  ;;  %v1058_v58 = vpop.f32.mrb[17].mxu1  ;;  %v909_v52 = vpop.permute.xlu0 %908 }
 0x2bc   : > { %v1059_v60 = vadd.f32 %v1058_v58, %v897_v54 }
 0x2bd   : > { %v1138_v62 = vmax.f32 %v1064_v56, 0.0 }
 0x2be   : > { %v1137_v0 = vmax.f32 %v1059_v60, 0.0 }
 0x2c0   : > { %v3038_v2 = vpack.i.bf16 %v1138_v62, %v1137_v0  ;;  %2679 = vmatprep.mubr.msk.f32.mxu1 %vm681_vm2, %v1137_v0  ;;  %v1826_v0 = vld [vmem:[%s4018_s7 + $0x8] sm:$0xff] }
 0x2c1   : > { %2680 = vmatmul.mubr.msk.f32.vlgmr.msra.gmra.mrb[32].mxu1 %vm681_vm2, %v1138_v62  ;;  %v1825_v62 = vld [vmem:[%s4018_s7] sm:$0xff] }
 0x2c2   : > { %v2652_v7 = vpop.f32.mrb[18].mxu1  ;;  %3039 = vrot.lane.b32.xlu1 %v3038_v2, %s3213_s12 }
 0x2c3   : > { %v1074_v12 = vadd.f32 %v2652_v7, %v903_v6  ;;  %v1068_v14 = vpop.f32.mrb[19].mxu1  ;;  %v2933_v6 = vpack.c.bf16 %v1826_v0, %v1825_v62 }
 0x2c4   : > { %v1069_v16 = vadd.f32 %v1068_v14, %v901_v10  ;;  %v915_v10 = vpop.permute.xlu1 %914  ;;  %v913_v14 = vpop.permute.xlu0 %912 }
 0x2c5   : > { %v1140_v18 = vmax.f32 %v1074_v12, 0.0  ;;  %2934 = vmatprep.subr.bf16.mxu0 %v2933_v6 }
 0x2c6   : > { %v1139_v20 = vmax.f32 %v1069_v16, 0.0  ;;  %2936 = vmatpush3.bf16.msra.mxu0 %v2933_v6 }
 0x2c8   : > { %v3043_v24 = vpack.i.bf16 %v1140_v18, %v1139_v20  ;;  %2682 = vmatprep.mubr.msk.f32.mxu1 %vm681_vm2, %v1139_v20 }
 0x2c9   : > { %2683 = vmatmul.mubr.msk.f32.gmra.mrb[34].mxu1 %vm681_vm2, %v1140_v18 }
 0x2ca   : > { %v2655_v28 = vpop.f32.mrb[20].mxu1  ;;  %3044 = vrot.lane.b32.xlu0 %v3043_v24, %s3213_s12 }
 0x2cb   : > { %v1084_v32 = vadd.f32 %v2655_v28, %v907_v26  ;;  %v1078_v34 = vpop.f32.mrb[21].mxu1 }
 0x2cc   : > { %v1079_v36 = vadd.f32 %v1078_v34, %v905_v30  ;;  %v919_v30 = vpop.permute.xlu1 %918  ;;  %v917_v34 = vpop.permute.xlu0 %916 }
 0x2cd   : > { %v1142_v38 = vmax.f32 %v1084_v32, 0.0 }
 0x2ce   : > { %v1141_v42 = vmax.f32 %v1079_v36, 0.0 }
 0x2d0   : > { %v3048_v44 = vpack.i.bf16 %v1142_v38, %v1141_v42  ;;  %2685 = vmatprep.mubr.msk.f32.mxu1 %vm681_vm2, %v1141_v42 }
 0x2d1   : > { %2686 = vmatmul.mubr.msk.f32.gmra.mrb[36].mxu1 %vm681_vm2, %v1142_v38 }
 0x2d2   : > { %v2658_v48 = vpop.f32.mrb[22].mxu1  ;;  %3049 = vrot.lane.b32.xlu1 %v3048_v44, %s3213_s12 }
 0x2d3   : > { %v1094_v54 = vadd.f32 %v2658_v48, %v911_v46  ;;  %v1088_v56 = vpop.f32.mrb[23].mxu1 }
 0x2d4   : > { %v1089_v58 = vadd.f32 %v1088_v56, %v909_v52  ;;  %v923_v52 = vpop.permute.xlu1 %922  ;;  %v921_v56 = vpop.permute.xlu0 %920 }
 0x2d5   : > { %v1144_v60 = vmax.f32 %v1094_v54, 0.0 }
 0x2d6   : > { %v1143_v2 = vmax.f32 %v1089_v58, 0.0 }
 0x2d8   : > { %v3053_v7 = vpack.i.bf16 %v1144_v60, %v1143_v2  ;;  %2688 = vmatprep.mubr.msk.f32.mxu1 %vm681_vm2, %v1143_v2 }
 0x2d9   : > { %2689 = vmatmul.mubr.msk.f32.gmra.mrb[38].mxu1 %vm681_vm2, %v1144_v60 }
 0x2da   : > { %v2661_v12 = vpop.f32.mrb[24].mxu1  ;;  %3054 = vrot.lane.b32.xlu0 %v3053_v7, %s3213_s12  ;;  %v927_v7 = vpop.permute.xlu1 %926 }
 0x2db   : > { %v1104_v16 = vadd.f32 %v2661_v12, %v915_v10  ;;  %v1098_v18 = vpop.f32.mrb[25].mxu1  ;;  %v925_v12 = vpop.permute.xlu0 %924 }
 0x2dc   : > { %v1099_v20 = vadd.f32 %v1098_v18, %v913_v14 }
 0x2dd   : > { %v1146_v24 = vmax.f32 %v1104_v16, 0.0 }
 0x2de   : > { %v1145_v26 = vmax.f32 %v1099_v20, 0.0 }
 0x2e0   : > { %v3068_v28 = vpack.i.bf16 %v1146_v24, %v1145_v26  ;;  %2691 = vmatprep.mubr.msk.f32.mxu1 %vm681_vm2, %v1145_v26 }
 0x2e1   : > { %2692 = vmatmul.mubr.msk.f32.gmra.mrb[40].mxu1 %vm681_vm2, %v1146_v24 }
 0x2e2   : > { %v2664_v32 = vpop.f32.mrb[26].mxu1  ;;  %3069 = vrot.lane.b32.xlu1 %v3068_v28, %s3213_s12  ;;  %v1827_v28 = vld [vmem:[%s4018_s7 + $0x10] sm:$0xff] }
 0x2e3   : > { %v1114_v36 = vadd.f32 %v2664_v32, %v919_v30  ;;  %v1108_v38 = vpop.f32.mrb[27].mxu1  ;;  %v1828_v30 = vld [vmem:[%s4018_s7 + $0x18] sm:$0xff] }
 0x2e4   : > { %v1109_v42 = vadd.f32 %v1108_v38, %v917_v34  ;;  %v2937_v32 = vpack.c.bf16 %v1828_v30, %v1827_v28  ;;  %v1625_v34 = vld [vmem:[%s4015_s4] sm:$0xff]  ;;  %v1627_v38 = vld [vmem:[%s4015_s4 + $0x10] sm:$0xff]  ;;  %v1640_v28 = vld [vmem:[%s4015_s4 + $0x78] sm:$0xff] }
 0x2e5   : > { %v1148_v44 = vmax.f32 %v1114_v36, 0.0  ;;  %v1626_v36 = vld [vmem:[%s4015_s4 + $0x8] sm:$0xff] }
 0x2e6   : > { %v1147_v46 = vmax.f32 %v1109_v42, 0.0  ;;  %2938 = vmatprep.subr.bf16.mxu0 %v2937_v32  ;;  %v2901_v42 = vpack.c.bf16 %v1626_v36, %v1625_v34  ;;  %v1159_v36 = vpop.permute.xlu0 %1158 }
 0x2e7   : > { %2940 = vmatpush3.bf16.msra.mxu0 %v2937_v32  ;;  %v1161_v32 = vpop.permute.xlu1 %1160 }
 0x2e8   : > { %v3690_v48 = vpack.i.bf16 %v1148_v44, %v1147_v46  ;;  %2694 = vmatprep.mubr.msk.f32.mxu1 %vm681_vm2, %v1147_v46  ;;  %2902 = vmatprep.subr.bf16.mxu1 %v2901_v42 }
 0x2e9   : > { %2695 = vmatmul.mubr.msk.f32.gmra.mrb[42].mxu1 %vm681_vm2, %v1148_v44  ;;  %v1628_v44 = vld [vmem:[%s4015_s4 + $0x18] sm:$0xff] }
 0x2ea   : > { %v2667_v54 = vpop.f32.mrb[28].mxu1  ;;  %v2905_v46 = vpack.c.bf16 %v1628_v44, %v1627_v38  ;;  %2904 = vmatpush3.bf16.msra.mxu1 %v2901_v42 }
 0x2eb   : > { %v1124_v58 = vadd.f32 %v2667_v54, %v923_v52  ;;  %v1118_v60 = vpop.f32.mrb[29].mxu1  ;;  %v1629_v52 = vld [vmem:[%s4015_s4 + $0x20] sm:$0xff]  ;;  %v1630_v54 = vld [vmem:[%s4015_s4 + $0x28] sm:$0xff] }
 0x2ec   : > { %v1119_v62 = vadd.f32 %v1118_v60, %v921_v56  ;;  %2906 = vmatprep.subr.bf16.mxu1 %v2905_v46  ;;  %v2909_v56 = vpack.c.bf16 %v1630_v54, %v1629_v52  ;;  %v1632_v60 = vld [vmem:[%s4015_s4 + $0x38] sm:$0xff] }
 0x2ed   : > { %v1150_v0 = vmax.f32 %v1124_v58, 0.0  ;;  %v1631_v58 = vld [vmem:[%s4015_s4 + $0x30] sm:$0xff] }
 0x2ee   : > { %v1149_v2 = vmax.f32 %v1119_v62, 0.0  ;;  %2908 = vmatpush3.bf16.msra.mxu1 %v2905_v46  ;;  %v2913_v62 = vpack.c.bf16 %v1632_v60, %v1631_v58  ;;  %v1163_v60 = vpop.permute.xlu0 %1162 }
 0x2ef   : > { %2910 = vmatprep.subr.bf16.mxu1 %v2909_v56 }
 0x2f0   : > { %v3694_v6 = vpack.i.bf16 %v1150_v0, %v1149_v2  ;;  %2697 = vmatprep.mubr.msk.f32.mxu1 %vm681_vm2, %v1149_v2  ;;  %v1634_v2 = vld [vmem:[%s4015_s4 + $0x48] sm:$0xff] }
 0x2f1   : > { %2698 = vmatmul.mubr.msk.f32.gmra.mrb[44].mxu1 %vm681_vm2, %v1150_v0  ;;  %v1633_v0 = vld [vmem:[%s4015_s4 + $0x40] sm:$0xff] }
 0x2f2   : > { %v2670_v10 = vpop.f32.mrb[30].mxu1  ;;  %2912 = vmatpush3.bf16.msra.mxu1 %v2909_v56  ;;  %v1165_v56 = vpop.permute.xlu1 %1164 }
 0x2f3   : > { %v1134_v14 = vadd.f32 %v2670_v10, %v927_v7  ;;  %v1128_v16 = vpop.f32.mrb[31].mxu1  ;;  %2914 = vmatprep.subr.bf16.mxu1 %v2913_v62  ;;  %v2917_v7 = vpack.c.bf16 %v1634_v2, %v1633_v0  ;;  %v1635_v10 = vld [vmem:[%s4015_s4 + $0x50] sm:$0xff] }
 0x2f4   : > { %v1129_v18 = vadd.f32 %v1128_v16, %v925_v12  ;;  %v1636_v12 = vld [vmem:[%s4015_s4 + $0x58] sm:$0xff]  ;;  %v1637_v16 = vld [vmem:[%s4015_s4 + $0x60] sm:$0xff] }
 0x2f5   : > { %v1152_v20 = vmax.f32 %v1134_v14, 0.0  ;;  %v2921_v14 = vpack.c.bf16 %v1636_v12, %v1635_v10 }
 0x2f6   : > { %v1151_v24 = vmax.f32 %v1129_v18, 0.0  ;;  %2916 = vmatpush3.bf16.msra.mxu1 %v2913_v62  ;;  %v1638_v18 = vld [vmem:[%s4015_s4 + $0x68] sm:$0xff] }
 0x2f7   : > { %2918 = vmatprep.subr.bf16.mxu1 %v2917_v7 }
 0x2f8   : > { %v3698_v26 = vpack.i.bf16 %v1152_v20, %v1151_v24  ;;  %2700 = vmatprep.mubr.msk.f32.mxu1 %vm681_vm2, %v1151_v24  ;;  %v1639_v24 = vld [vmem:[%s4015_s4 + $0x70] sm:$0xff] }
 0x2f9   : > { %2701 = vmatmul.mubr.msk.f32.gmra.mrb[46].mxu1 %vm681_vm2, %v1152_v20  ;;  %v2925_v20 = vpack.c.bf16 %v1638_v18, %v1637_v16  ;;  %v2929_v30 = vpack.c.bf16 %v1640_v28, %v1639_v24  ;;  %v1167_v18 = vpop.permute.xlu0 %1166 }
 0x2fa   : > { %2920 = vmatpush3.bf16.msra.mxu1 %v2917_v7 }
 0x2fb   : > { %2922 = vmatprep.subr.bf16.mxu1 %v2921_v14 }
 0x2fe   : > { %2924 = vmatpush3.bf16.msra.mxu1 %v2921_v14  ;;  %v1169_v14 = vpop.permute.xlu1 %1168 }
 0x2ff   : > { %2926 = vmatprep.subr.bf16.mxu1 %v2925_v20 }
 0x302   : > { %2928 = vmatpush3.bf16.msra.mxu1 %v2925_v20 }
 0x303   : > { %2930 = vmatprep.subr.bf16.mxu1 %v2929_v30 }
 0x306   : > { %2932 = vmatpush3.bf16.msra.mxu1 %v2929_v30 }
 0x394   : > { %v2681_v34 = vpop.f32.mrb[32].mxu1 }
 0x395   : > { %v1326_v38 = vadd.f32 %v2681_v34, %v1161_v32  ;;  %v1320_v42 = vpop.f32.mrb[33].mxu1 }
 0x396   : > { %v1321_v44 = vadd.f32 %v1320_v42, %v1159_v36 }
 0x397   : > { %v1400_v46 = vmax.f32 %v1326_v38, 0.0  ;;  %v1171_v38 = vpop.permute.xlu0 %1170 }
 0x398   : > { %v1399_v52 = vmax.f32 %v1321_v44, 0.0 }
 0x39a   : > { %v3058_v54 = vpack.i.bf16 %v1400_v46, %v1399_v52  ;;  %2767 = vmatprep.mubr.msk.f32.mxu0 %vm681_vm2, %v1399_v52 }
 0x39b   : > { %2768 = vmatmul.mubr.msk.f32.vlgmr.msra.gmra.mrb[32].mxu0 %vm681_vm2, %v1400_v46 }
 0x39c   : > { %v2684_v58 = vpop.f32.mrb[34].mxu1  ;;  %3059 = vrot.lane.b32.xlu0 %v3058_v54, %s3212_s11 }
 0x39d   : > { %v1336_v62 = vadd.f32 %v2684_v58, %v1165_v56  ;;  %v1330_v0 = vpop.f32.mrb[35].mxu1 }
 0x39e   : > { %v1331_v2 = vadd.f32 %v1330_v0, %v1163_v60  ;;  %v1175_v60 = vpop.permute.xlu0 %1174 }
 0x39f   : > { %v1402_v7 = vmax.f32 %v1336_v62, 0.0 }
 0x3a0   : > { %v1401_v10 = vmax.f32 %v1331_v2, 0.0  ;;  %3064 = vrot.lane.b32.xlu0 %v3647_v50, %s3214_s22  ;;  %v1173_v50 = vpop.permute.xlu1 %1172 }
 0x3a2   : > { %v3073_v12 = vpack.i.bf16 %v1402_v7, %v1401_v10  ;;  %2770 = vmatprep.mubr.msk.f32.mxu0 %vm681_vm2, %v1401_v10 }
 0x3a3   : > { %2771 = vmatmul.mubr.msk.f32.gmra.mrb[34].mxu0 %vm681_vm2, %v1402_v7 }
 0x3a4   : > { %v2687_v16 = vpop.f32.mrb[36].mxu1  ;;  %3074 = vrot.lane.b32.xlu1 %v3073_v12, %s3212_s11 }
 0x3a5   : > { %v1346_v20 = vadd.f32 %v2687_v16, %v1169_v14  ;;  %v1340_v24 = vpop.f32.mrb[37].mxu1  ;;  %v1179_v16 = vpop.permute.xlu0 %1178 }
 0x3a6   : > { %v1341_v28 = vadd.f32 %v1340_v24, %v1167_v18 }
 0x3a7   : > { %v1404_v30 = vmax.f32 %v1346_v20, 0.0 }
 0x3a8   : > { %v1403_v32 = vmax.f32 %v1341_v28, 0.0  ;;  %3079 = vrot.lane.b32.xlu1 %v3651_v4, %s3214_s22  ;;  %v1177_v4 = vpop.permute.xlu1 %1176 }
 0x3aa   : > { %v3083_v34 = vpack.i.bf16 %v1404_v30, %v1403_v32  ;;  %2773 = vmatprep.mubr.msk.f32.mxu0 %vm681_vm2, %v1403_v32 }
 0x3ab   : > { %2774 = vmatmul.mubr.msk.f32.gmra.mrb[36].mxu0 %vm681_vm2, %v1404_v30 }
 0x3ac   : > { %v2690_v36 = vpop.f32.mrb[38].mxu1  ;;  %3084 = vrot.lane.b32.xlu0 %v3083_v34, %s3212_s11 }
 0x3ad   : > { %v1356_v42 = vadd.f32 %v2690_v36, %v1173_v50  ;;  %v1350_v44 = vpop.f32.mrb[39].mxu1  ;;  %v1183_v50 = vpop.permute.xlu0 %1182 }
 0x3ae   : > { %v1351_v46 = vadd.f32 %v1350_v44, %v1171_v38 }
 0x3af   : > { %v1406_v52 = vmax.f32 %v1356_v42, 0.0 }
 0x3b0   : > { %v1405_v54 = vmax.f32 %v1351_v46, 0.0  ;;  %3089 = vrot.lane.b32.xlu0 %v3690_v48, %s3213_s12  ;;  %v1181_v48 = vpop.permute.xlu1 %1180 }
 0x3b2   : > { %v3093_v56 = vpack.i.bf16 %v1406_v52, %v1405_v54  ;;  %2776 = vmatprep.mubr.msk.f32.mxu0 %vm681_vm2, %v1405_v54 }
 0x3b3   : > { %2777 = vmatmul.mubr.msk.f32.gmra.mrb[38].mxu0 %vm681_vm2, %v1406_v52 }
 0x3b4   : > { %v2693_v58 = vpop.f32.mrb[40].mxu1  ;;  %3094 = vrot.lane.b32.xlu1 %v3093_v56, %s3212_s11  ;;  %v1187_v56 = vpop.permute.xlu0 %1186 }
 0x3b5   : > { %v1366_v62 = vadd.f32 %v2693_v58, %v1177_v4  ;;  %v1360_v0 = vpop.f32.mrb[41].mxu1 }
 0x3b6   : > { %v1361_v2 = vadd.f32 %v1360_v0, %v1175_v60 }
 0x3b7   : > { %v1408_v7 = vmax.f32 %v1366_v62, 0.0 }
 0x3b8   : > { %v1407_v10 = vmax.f32 %v1361_v2, 0.0  ;;  %3109 = vrot.lane.b32.xlu1 %v3694_v6, %s3213_s12  ;;  %v1185_v6 = vpop.permute.xlu1 %1184 }
 0x3ba   : > { %v3098_v12 = vpack.i.bf16 %v1408_v7, %v1407_v10  ;;  %2779 = vmatprep.mubr.msk.f32.mxu0 %vm681_vm2, %v1407_v10 }
 0x3bb   : > { %2780 = vmatmul.mubr.msk.f32.gmra.mrb[40].mxu0 %vm681_vm2, %v1408_v7 }
 0x3bc   : > { %v2696_v14 = vpop.f32.mrb[42].mxu1  ;;  %3099 = vrot.lane.b32.xlu0 %v3098_v12, %s3212_s11 }
 0x3bd   : > { %v1376_v18 = vadd.f32 %v2696_v14, %v1181_v48  ;;  %v1370_v20 = vpop.f32.mrb[43].mxu1 }
 0x3be   : > { %v1371_v24 = vadd.f32 %v1370_v20, %v1179_v16 }
 0x3bf   : > { %v1410_v28 = vmax.f32 %v1376_v18, 0.0 }
 0x3c0   : > { %v1409_v30 = vmax.f32 %v1371_v24, 0.0  ;;  %3104 = vrot.lane.b32.xlu0 %v3655_v22, %s3214_s22  ;;  %v1189_v22 = vpop.permute.xlu1 %1188 }
 0x3c2   : > { %v3113_v32 = vpack.i.bf16 %v1410_v28, %v1409_v30  ;;  %2782 = vmatprep.mubr.msk.f32.mxu0 %vm681_vm2, %v1409_v30 }
 0x3c3   : > { %2783 = vmatmul.mubr.msk.f32.gmra.mrb[42].mxu0 %vm681_vm2, %v1410_v28 }
 0x3c4   : > { %v2699_v34 = vpop.f32.mrb[44].mxu1  ;;  %3114 = vrot.lane.b32.xlu1 %v3113_v32, %s3212_s11  ;;  %v3025_v7 = vpop.permute.xlu1 %3024 }
 0x3c5   : > { %v1386_v36 = vadd.f32 %v2699_v34, %v1185_v6  ;;  %v1380_v38 = vpop.f32.mrb[45].mxu1  ;;  %v3027_v13 = vunpack.i.h.bf16 %v3025_v7 }
 0x3c6   : > { %v1381_v42 = vadd.f32 %v1380_v38, %v1183_v50 }
 0x3c7   : > { %v1412_v44 = vmax.f32 %v1386_v36, 0.0 }
 0x3c8   : > { %v1411_v46 = vmax.f32 %v1381_v42, 0.0  ;;  %3119 = vrot.lane.b32.xlu1 %v3659_v40, %s3214_s22  ;;  %v3020_v40 = vpop.permute.xlu0 %3019  ;;  %v3794_v12 = vpop.permute.xlu1 %3034 }
 0x3c9   : > { %v3022_v18 = vunpack.i.h.bf16 %v3020_v40  ;;  %v3021_v20 = vunpack.i.l.bf16 %v3020_v40  ;;  %v3036_v25 = vunpack.i.l.bf16 %v3794_v12 }
 0x3ca   : > { %v3123_v52 = vpack.i.bf16 %v1412_v44, %v1411_v46  ;;  %2785 = vmatprep.mubr.msk.f32.mxu0 %vm681_vm2, %v1411_v46 }
 0x3cb   : > { %2786 = vmatmul.mubr.msk.f32.gmra.mrb[44].mxu0 %vm681_vm2, %v1412_v44  ;;  %v1576_v32 = vsel %vm681_vm2, %v598_v15, %v3022_v18  ;;  %v1575_v50 = vsel %vm681_vm2, %v597_v11, %v3021_v20 }
 0x3cc   : > { %v2702_v54 = vpop.f32.mrb[46].mxu1  ;;  %3124 = vrot.lane.b32.xlu0 %v3123_v52, %s3212_s11  ;;  %v3030_v10 = vpop.permute.xlu0 %3029  ;;  %v3026_v52 = vunpack.i.l.bf16 %v3025_v7 }
 0x3cd   : > { %v1396_v4 = vadd.f32 %v2702_v54, %v1189_v22  ;;  %v1390_v58 = vpop.f32.mrb[47].mxu1  ;;  %v3040_v14 = vpop.permute.xlu1 %3039  ;;  %v3032_v40 = vunpack.i.h.bf16 %v3030_v10  ;;  %v3031_v7 = vunpack.i.l.bf16 %v3030_v10 }
 0x3ce   : > { %v1391_v60 = vadd.f32 %v1390_v58, %v1187_v56  ;;  %v3042_v24 = vunpack.i.h.bf16 %v3040_v14  ;;  %v1577_v11 = vsel %vm681_vm2, %v599_v19, %v3026_v52 }
 0x3cf   : > { %v1414_v62 = vmax.f32 %v1396_v4, 0.0  ;;  %v1578_v4 = vsel %vm681_vm2, %v600_v23, %v3027_v13  ;;  %v1579_v23 = vsel %vm681_vm2, %v601_v27, %v3031_v7  ;;  %v1580_v18 = vsel %vm681_vm2, %v602_v31, %v3032_v40 }
 0x3d0   : > { %v1413_v0 = vmax.f32 %v1391_v60, 0.0  ;;  %3129 = vrot.lane.b32.xlu0 %v3698_v26, %s3213_s12  ;;  %v3045_v48 = vpop.permute.xlu0 %3044  ;;  %v3041_v26 = vunpack.i.l.bf16 %v3040_v14  ;;  %v1593_v36 = vsel %vm1591_vm3, %v1576_v32, %v3042_v24  ;;  %s3974_s12 = scalar_lea.vmem %s4020_s9, %s2351_s20 }
 0x3d1   : > { %v3050_v28 = vpop.permute.xlu1 %3049  ;;  %v3047_v15 = vunpack.i.h.bf16 %v3045_v48  ;;  %v3046_v22 = vunpack.i.l.bf16 %v3045_v48 }
 0x3d2   : > { %v3133_v2 = vpack.i.bf16 %v1414_v62, %v1413_v0  ;;  %2788 = vmatprep.mubr.msk.f32.mxu0 %vm681_vm2, %v1413_v0  ;;  %v1592_v38 = vsel %vm1591_vm3, %v1575_v50, %v3041_v26  ;;  %v3052_v17 = vunpack.i.h.bf16 %v3050_v28  ;;  %v3051_v48 = vunpack.i.l.bf16 %v3050_v28 }
 0x3d3   : > { %2789 = vmatmul.mubr.msk.f32.gmra.mrb[46].mxu0 %vm681_vm2, %v1414_v62  ;;  %v1594_v58 = vsel %vm1591_vm3, %v1577_v11, %v3046_v22  ;;  %v1595_v60 = vsel %vm1591_vm3, %v1578_v4, %v3047_v15  ;;  %v1813_v15 = vld [vmem:[%s4017_s6 + $0x20] sm:$0xff]  ;;  %v1814_v22 = vld [vmem:[%s4017_s6 + $0x28] sm:$0xff]  ;;  %v1815_v4 = vld [vmem:[%s4017_s6 + $0x30] sm:$0xff] }
 0x3d4   : > { %3134 = vrot.lane.b32.xlu1 %v3133_v2, %s3212_s11  ;;  %v3796_v16 = vpop.permute.xlu0 %3054  ;;  %v1596_v20 = vsel %vm1591_vm3, %v1579_v23, %v3051_v48  ;;  %v1597_v24 = vsel %vm1591_vm3, %v1580_v18, %v3052_v17  ;;  %v1817_v17 = vld [vmem:[%s4017_s6 + $0x40] sm:$0xff] }
 0x3d5   : > { %v3808_v46 = vpop.permute.xlu1 %3069  ;;  %v3057_v27 = vunpack.i.h.bf16 %v3796_v16  ;;  %v3056_v29 = vunpack.i.l.bf16 %v3796_v16  ;;  %v1810_v16 = vld [vmem:[%s4017_s6 + $0x8] sm:$0xff] }
 0x40e   : > { %v3060_v30 = vpop.permute.xlu0 %3059 }
 0x40f   : > { %v3062_v6 = vunpack.i.h.bf16 %v3060_v30  ;;  %v3061_v34 = vunpack.i.l.bf16 %v3060_v30  ;;  %v3037_v30 = vunpack.i.h.bf16 %v3794_v12  ;;  %v1809_v12 = vld [vmem:[%s4017_s6] sm:$0xff] }
 0x410   : > { %v2941_v37 = vpack.c.bf16 %v1810_v16, %v1809_v12 }
 0x411   : > { %v1609_v42 = vsel %vm1608_vm4, %v1592_v38, %v3061_v34  ;;  %v1610_v44 = vsel %vm1608_vm4, %v1593_v36, %v3062_v6  ;;  %v1581_v34 = vsel %vm681_vm2, %v603_v35, %v3036_v25  ;;  %v1582_v50 = vsel %vm681_vm2, %v604_v39, %v3037_v30  ;;  %v1811_v36 = vld [vmem:[%s4017_s6 + $0x10] sm:$0xff]  ;;  %v1812_v39 = vld [vmem:[%s4017_s6 + $0x18] sm:$0xff] }
 0x412   : > { %2735 = vmatprep.mubr.f32.mxu1 %v1609_v42  ;;  %v3065_v2 = vpop.permute.xlu0 %3064  ;;  %v1598_v33 = vsel %vm1591_vm3, %v1581_v34, %v3056_v29  ;;  %v1599_v35 = vsel %vm1591_vm3, %v1582_v50, %v3057_v27  ;;  %v2945_v52 = vpack.c.bf16 %v1812_v39, %v1811_v36  ;;  %2942 = vmatprep.subr.bf16.mxu0 %v2941_v37 }
 0x413   : > { %2736 = vmatmul.mubr.f32.vlgmr.msra.gmra.mrb[48].mxu1 %v1610_v44  ;;  %v3067_v38 = vunpack.i.h.bf16 %v3065_v2  ;;  %v3066_v42 = vunpack.i.l.bf16 %v3065_v2  ;;  %2944 = vmatpush3.bf16.msra.mxu0 %v2941_v37 }
 0x414   : > { %2946 = vmatprep.subr.bf16.mxu0 %v2945_v52  ;;  %2973 = vmatprep.subr.bf16.mxu1 %v2941_v37 }
 0x415   : > { %v1584_v11 = vsel %vm681_vm2, %v606_v47, %v3067_v38  ;;  %2981 = vmatpush3.bf16.msra.mxu1 %v2941_v37 }
 0x416   : > { %v3075_v54 = vpop.permute.xlu1 %3074  ;;  %2974 = vmatprep.subr.bf16.mxu1 %v2945_v52 }
 0x417   : > { %v3077_v9 = vunpack.i.h.bf16 %v3075_v54  ;;  %v3076_v56 = vunpack.i.l.bf16 %v3075_v54  ;;  %2948 = vmatpush3.bf16.msra.mxu0 %v2945_v52 }
 0x419   : > { %v1611_v62 = vsel %vm1608_vm4, %v1594_v58, %v3076_v56  ;;  %v1612_v0 = vsel %vm1608_vm4, %v1595_v60, %v3077_v9  ;;  %v2949_v9 = vpack.c.bf16 %v1814_v22, %v1813_v15  ;;  %v1583_v56 = vsel %vm681_vm2, %v605_v43, %v3066_v42  ;;  %v1816_v58 = vld [vmem:[%s4017_s6 + $0x38] sm:$0xff]  ;;  %2982 = vmatpush3.bf16.msra.mxu1 %v2945_v52 }
 0x41a   : > { %2738 = vmatprep.mubr.f32.mxu1 %v1611_v62  ;;  %v3828_v26 = vpop.permute.xlu1 %3079  ;;  %v3072_v60 = vunpack.i.h.bf16 %v3808_v46  ;;  %v3071_v62 = vunpack.i.l.bf16 %v3808_v46  ;;  %v2953_v2 = vpack.c.bf16 %v1816_v58, %v1815_v4  ;;  %v1818_v46 = vld [vmem:[%s4017_s6 + $0x48] sm:$0xff] }
 0x41b   : > { %2739 = vmatmul.mubr.f32.gmra.mrb[50].mxu1 %v1612_v0  ;;  %2950 = vmatprep.subr.bf16.mxu0 %v2949_v9  ;;  %v2957_v18 = vpack.c.bf16 %v1818_v46, %v1817_v17 }
 0x41c   : > { %v1600_v45 = vsel %vm1591_vm3, %v1583_v56, %v3071_v62  ;;  %v1601_v47 = vsel %vm1591_vm3, %v1584_v11, %v3072_v60  ;;  %2975 = vmatprep.subr.bf16.mxu1 %v2949_v9  ;;  %2952 = vmatpush3.bf16.msra.mxu0 %v2949_v9 }
 0x41d   : > { %2954 = vmatprep.subr.bf16.mxu0 %v2953_v2  ;;  %2983 = vmatpush3.bf16.msra.mxu1 %v2949_v9 }
 0x41e   : > { %v3085_v19 = vpop.permute.xlu0 %3084  ;;  %2976 = vmatprep.subr.bf16.mxu1 %v2953_v2 }
 0x41f   : > { %v3087_v14 = vunpack.i.h.bf16 %v3085_v19  ;;  %v3086_v21 = vunpack.i.l.bf16 %v3085_v19  ;;  %v3082_v19 = vunpack.i.h.bf16 %v3828_v26 }
 0x420   : > { %2956 = vmatpush3.bf16.msra.mxu0 %v2953_v2 }
 0x421   : > { %v1613_v10 = vsel %vm1608_vm4, %v1596_v20, %v3086_v21  ;;  %v1614_v28 = vsel %vm1608_vm4, %v1597_v24, %v3087_v14  ;;  %v3081_v14 = vunpack.i.l.bf16 %v3828_v26  ;;  %v1819_v20 = vld [vmem:[%s4017_s6 + $0x50] sm:$0xff]  ;;  %v1820_v24 = vld [vmem:[%s4017_s6 + $0x58] sm:$0xff]  ;;  %v1586_v27 = vsel %vm681_vm2, %v608_v55, %v3082_v19  ;;  %2958 = vmatprep.subr.bf16.mxu0 %v2957_v18  ;;  %2984 = vmatpush3.bf16.msra.mxu1 %v2953_v2 }
 0x422   : > { %2741 = vmatprep.mubr.f32.mxu1 %v1613_v10  ;;  %v3090_v54 = vpop.permute.xlu0 %3089  ;;  %2977 = vmatprep.subr.bf16.mxu1 %v2957_v18 }
 0x423   : > { %2742 = vmatmul.mubr.f32.gmra.mrb[52].mxu1 %v1614_v28  ;;  %v3092_v21 = vunpack.i.h.bf16 %v3090_v54  ;;  %v3091_v23 = vunpack.i.l.bf16 %v3090_v54  ;;  %v1585_v25 = vsel %vm681_vm2, %v607_v51, %v3081_v14  ;;  %v1822_v51 = vld [vmem:[%s4017_s6 + $0x68] sm:$0xff] }
 0x424   : > { %2960 = vmatpush3.bf16.msra.mxu0 %v2957_v18  ;;  %v2965_v53 = vpack.c.bf16 %v1822_v51, %v1821_v49 }
 0x425   : > { %v1602_v29 = vsel %vm1591_vm3, %v1585_v25, %v3091_v23  ;;  %2985 = vmatpush3.bf16.msra.mxu1 %v2957_v18 }
 0x426   : > { %v3095_v31 = vpop.permute.xlu1 %3094 }
 0x427   : > { %v3097_v32 = vunpack.i.h.bf16 %v3095_v31  ;;  %v3096_v6 = vunpack.i.l.bf16 %v3095_v31  ;;  %v1603_v31 = vsel %vm1591_vm3, %v1586_v27, %v3092_v21 }
 0x429   : > { %v1615_v44 = vsel %vm1608_vm4, %v1598_v33, %v3096_v6  ;;  %v1616_v13 = vsel %vm1608_vm4, %v1599_v35, %v3097_v32  ;;  %v2961_v32 = vpack.c.bf16 %v1820_v24, %v1819_v20 }
 0x42a   : > { %2744 = vmatprep.mubr.f32.mxu1 %v1615_v44  ;;  %v3110_v48 = vpop.permute.xlu1 %3109 }
 0x42b   : > { %2745 = vmatmul.mubr.f32.gmra.mrb[54].mxu1 %v1616_v13  ;;  %2962 = vmatprep.subr.bf16.mxu0 %v2961_v32  ;;  %v3112_v36 = vunpack.i.h.bf16 %v3110_v48  ;;  %v3111_v38 = vunpack.i.l.bf16 %v3110_v48 }
 0x42c   : > { %2978 = vmatprep.subr.bf16.mxu1 %v2961_v32  ;;  %2964 = vmatpush3.bf16.msra.mxu0 %v2961_v32 }
 0x42d   : > { %2966 = vmatprep.subr.bf16.mxu0 %v2965_v53  ;;  %2986 = vmatpush3.bf16.msra.mxu1 %v2961_v32 }
 0x42e   : > { %v3100_v41 = vpop.permute.xlu0 %3099  ;;  %2979 = vmatprep.subr.bf16.mxu1 %v2965_v53 }
 0x42f   : > { %v3102_v43 = vunpack.i.h.bf16 %v3100_v41  ;;  %v3101_v0 = vunpack.i.l.bf16 %v3100_v41 }
 0x430   : > { %2968 = vmatpush3.bf16.msra.mxu0 %v2965_v53 }
 0x431   : > { %v1617_v40 = vsel %vm1608_vm4, %v1600_v45, %v3101_v0  ;;  %v1618_v7 = vsel %vm1608_vm4, %v1601_v47, %v3102_v43  ;;  %2987 = vmatpush3.bf16.msra.mxu1 %v2965_v53 }
 0x432   : > { %2747 = vmatprep.mubr.f32.mxu1 %v1617_v40  ;;  %v3105_v10 = vpop.permute.xlu0 %3104 }
 0x433   : > { %2748 = vmatmul.mubr.f32.gmra.mrb[56].mxu1 %v1618_v7  ;;  %v3107_v6 = vunpack.i.h.bf16 %v3105_v10  ;;  %v3106_v34 = vunpack.i.l.bf16 %v3105_v10  ;;  %v2426_v7 = vld [vmem:[%s4016_s5] ss:$0 sm:$0xff] }
 0x435   : > { %v1587_v55 = vsel %vm681_vm2, %v609_v59, %v3106_v34  ;;  %v1588_v16 = vsel %vm681_vm2, %v610_v63, %v3107_v6 }
 0x436   : > { %v3115_v28 = vpop.permute.xlu1 %3114  ;;  %v1604_v42 = vsel %vm1591_vm3, %v1587_v55, %v3111_v38  ;;  %v1605_v44 = vsel %vm1591_vm3, %v1588_v16, %v3112_v36 }
 0x437   : > { %v3117_v30 = vunpack.i.h.bf16 %v3115_v28  ;;  %v3116_v26 = vunpack.i.l.bf16 %v3115_v28 }
 0x439   : > { %v1619_v50 = vsel %vm1608_vm4, %v1602_v29, %v3116_v26  ;;  %v1620_v12 = vsel %vm1608_vm4, %v1603_v31, %v3117_v30 }
 0x43a   : > { %2750 = vmatprep.mubr.f32.mxu1 %v1619_v50  ;;  %v3120_v39 = vpop.permute.xlu1 %3119 }
 0x43b   : > { %2751 = vmatmul.mubr.f32.gmra.mrb[58].mxu1 %v1620_v12  ;;  %v3122_v63 = vunpack.i.h.bf16 %v3120_v39  ;;  %v3121_v13 = vunpack.i.l.bf16 %v3120_v39 }
 0x43d   : > { %v1589_v56 = vsel %vm681_vm2, %v611_v3, %v3121_v13  ;;  %v1590_v11 = vsel %vm681_vm2, %v612_v8, %v3122_v63  ;;  %v1824_v3 = vld [vmem:[%s4017_s6 + $0x78] sm:$0xff] }
 0x43e   : > { %v3125_v33 = vpop.permute.xlu0 %3124  ;;  %v2969_v5 = vpack.c.bf16 %v1824_v3, %v1823_v1 }
 0x43f   : > { %v3127_v35 = vunpack.i.h.bf16 %v3125_v33  ;;  %v3126_v37 = vunpack.i.l.bf16 %v3125_v33 }
 0x440   : > { %2970 = vmatprep.subr.bf16.mxu0 %v2969_v5  ;;  %2980 = vmatprep.subr.bf16.mxu1 %v2969_v5 }
 0x441   : > { %v1621_v57 = vsel %vm1608_vm4, %v1604_v42, %v3126_v37  ;;  %v1622_v59 = vsel %vm1608_vm4, %v1605_v44, %v3127_v35  ;;  %2972 = vmatpush3.bf16.msra.mxu0 %v2969_v5  ;;  %2988 = vmatpush3.bf16.msra.mxu1 %v2969_v5 }
 0x442   : > { %v3130_v61 = vpop.permute.xlu0 %3129  ;;  %2753 = vmatprep.mubr.f32.mxu1 %v1621_v57 }
 0x443   : > { %2754 = vmatmul.mubr.f32.gmra.mrb[60].mxu1 %v1622_v59  ;;  %v3132_v52 = vunpack.i.h.bf16 %v3130_v61  ;;  %v3131_v15 = vunpack.i.l.bf16 %v3130_v61 }
 0x445   : > { %v1606_v4 = vsel %vm1591_vm3, %v1589_v56, %v3131_v15  ;;  %v1607_v58 = vsel %vm1591_vm3, %v1590_v11, %v3132_v52 }
 0x446   : > { %v3135_v22 = vpop.permute.xlu1 %3134 }
 0x447   : > { %v3137_v54 = vunpack.i.h.bf16 %v3135_v22  ;;  %v3136_v9 = vunpack.i.l.bf16 %v3135_v22 }
 0x449   : > { %v1623_v60 = vsel %vm1608_vm4, %v1606_v4, %v3136_v9  ;;  %v1624_v62 = vsel %vm1608_vm4, %v1607_v58, %v3137_v54  ;;  %v3960_v4 = vld [vmem:[%s4019_s8] ss:$0 sm:$0xff] }
 0x44a   : > { %2756 = vmatprep.mubr.f32.mxu1 %v1623_v60 }
 0x44b   : > { %2757 = vmatmul.mubr.f32.gmra.mrb[62].mxu1 %v1624_v62 }
 0x48e   : > { %v3938_v8 = vpop.f32.mrb[40].mxu0 }
 0x48f   : > { %v3940_v41 = vpop.f32.mrb[41].mxu0 }
 0x496   : > { %v3942_v43 = vpop.f32.mrb[42].mxu0 }
 0x497   : > { %v3944_v0 = vpop.f32.mrb[43].mxu0 }
 0x49e   : > { %v3946_v45 = vpop.f32.mrb[44].mxu0 }
 0x49f   : > { %v3948_v47 = vpop.f32.mrb[45].mxu0 }
 0x4a6   : > { %v3950_v2 = vpop.f32.mrb[46].mxu0 }
 0x4a7   : > { %v3952_v40 = vpop.f32.mrb[47].mxu0 }
 0x4e6   : > { %v2737_v17 = vpop.f32.mrb[48].mxu1 }
 0x4e7   : > { %v1720_v46 = vadd.f32 %v2737_v17, %v2426_v7  ;;  %v1714_v48 = vpop.f32.mrb[49].mxu1 }
 0x4e8   : > { %v1715_v19 = vadd.f32 %v2426_v7, %v1714_v48 }
 0x4e9   : > { %v1794_v21 = vmax.f32 %v1720_v46, 0.0 }
 0x4ea   : > { %v1793_v14 = vmax.f32 %v1715_v19, 0.0 }
 0x4ec   : > { %2823 = vmatprep.mubr.f32.mxu0 %v1793_v14 }
 0x4ed   : > { %2824 = vmatmul.mubr.f32.vlgmr.msra.gmra.mrb[32].mxu0 %v1794_v21 }
 0x4ee   : > { %v2740_v23 = vpop.f32.mrb[50].mxu1 }
 0x4ef   : > { %v1730_v18 = vadd.f32 %v2740_v23, %v2426_v7  ;;  %v1724_v20 = vpop.f32.mrb[51].mxu1 }
 0x4f0   : > { %v1725_v24 = vadd.f32 %v2426_v7, %v1724_v20 }
 0x4f1   : > { %v1796_v28 = vmax.f32 %v1730_v18, 0.0 }
 0x4f2   : > { %v1795_v10 = vmax.f32 %v1725_v24, 0.0 }
 0x4f4   : > { %2826 = vmatprep.mubr.f32.mxu0 %v1795_v10 }
 0x4f5   : > { %2827 = vmatmul.mubr.f32.gmra.mrb[34].mxu0 %v1796_v28 }
 0x4f6   : > { %v2743_v30 = vpop.f32.mrb[52].mxu1 }
 0x4f7   : > { %v1740_v26 = vadd.f32 %v2743_v30, %v2426_v7  ;;  %v1734_v25 = vpop.f32.mrb[53].mxu1 }
 0x4f8   : > { %v1735_v27 = vadd.f32 %v2426_v7, %v1734_v25 }
 0x4f9   : > { %v1798_v31 = vmax.f32 %v1740_v26, 0.0 }
 0x4fa   : > { %v1797_v29 = vmax.f32 %v1735_v27, 0.0 }
 0x4fc   : > { %2829 = vmatprep.mubr.f32.mxu0 %v1797_v29 }
 0x4fd   : > { %2830 = vmatmul.mubr.f32.gmra.mrb[36].mxu0 %v1798_v31 }
 0x4fe   : > { %v2746_v32 = vpop.f32.mrb[54].mxu1 }
 0x4ff   : > { %v1750_v6 = vadd.f32 %v2746_v32, %v2426_v7  ;;  %v1744_v34 = vpop.f32.mrb[55].mxu1 }
 0x500   : > { %v1745_v50 = vadd.f32 %v2426_v7, %v1744_v34 }
 0x501   : > { %v1800_v49 = vmax.f32 %v1750_v6, 0.0 }
 0x502   : > { %v1799_v12 = vmax.f32 %v1745_v50, 0.0 }
 0x504   : > { %2832 = vmatprep.mubr.f32.mxu0 %v1799_v12 }
 0x505   : > { %2833 = vmatmul.mubr.f32.gmra.mrb[38].mxu0 %v1800_v49 }
 0x506   : > { %v2749_v51 = vpop.f32.mrb[56].mxu1 }
 0x507   : > { %v1760_v53 = vadd.f32 %v2749_v51, %v2426_v7  ;;  %v1754_v55 = vpop.f32.mrb[57].mxu1 }
 0x508   : > { %v1755_v16 = vadd.f32 %v2426_v7, %v1754_v55 }
 0x509   : > { %v1802_v38 = vmax.f32 %v1760_v53, 0.0 }
 0x50a   : > { %v1801_v36 = vmax.f32 %v1755_v16, 0.0 }
 0x50c   : > { %2835 = vmatprep.mubr.f32.mxu1 %v1801_v36 }
 0x50d   : > { %2836 = vmatmul.mubr.f32.vlgmr.msra.gmra.mrb[64].mxu1 %v1802_v38 }
 0x50e   : > { %v2752_v33 = vpop.f32.mrb[58].mxu1 }
 0x50f   : > { %v1770_v35 = vadd.f32 %v2752_v33, %v2426_v7  ;;  %v1764_v37 = vpop.f32.mrb[59].mxu1 }
 0x510   : > { %v1765_v39 = vadd.f32 %v2426_v7, %v1764_v37 }
 0x511   : > { %v1804_v44 = vmax.f32 %v1770_v35, 0.0 }
 0x512   : > { %v1803_v42 = vmax.f32 %v1765_v39, 0.0 }
 0x514   : > { %2838 = vmatprep.mubr.f32.mxu1 %v1803_v42 }
 0x515   : > { %2839 = vmatmul.mubr.f32.gmra.mrb[66].mxu1 %v1804_v44 }
 0x516   : > { %v2755_v57 = vpop.f32.mrb[60].mxu1 }
 0x517   : > { %v1780_v59 = vadd.f32 %v2755_v57, %v2426_v7  ;;  %v1774_v61 = vpop.f32.mrb[61].mxu1 }
 0x518   : > { %v1775_v63 = vadd.f32 %v2426_v7, %v1774_v61 }
 0x519   : > { %v1806_v52 = vmax.f32 %v1780_v59, 0.0 }
 0x51a   : > { %v1805_v13 = vmax.f32 %v1775_v63, 0.0 }
 0x51c   : > { %2841 = vmatprep.mubr.f32.mxu1 %v1805_v13 }
 0x51d   : > { %2842 = vmatmul.mubr.f32.gmra.mrb[68].mxu1 %v1806_v52 }
 0x51e   : > { %v2758_v15 = vpop.f32.mrb[62].mxu1 }
 0x51f   : > { %v1790_v22 = vadd.f32 %v2758_v15, %v2426_v7  ;;  %v1784_v54 = vpop.f32.mrb[63].mxu1 }
 0x520   : > { %v1785_v9 = vadd.f32 %v2426_v7, %v1784_v54 }
 0x521   : > { %v1808_v11 = vmax.f32 %v1790_v22, 0.0 }
 0x522   : > { %v1807_v56 = vmax.f32 %v1785_v9, 0.0 }
 0x524   : > { %2844 = vmatprep.mubr.f32.mxu1 %v1807_v56 }
 0x525   : > { %2845 = vmatmul.mubr.f32.gmra.mrb[70].mxu1 %v1808_v11 }
 0x5c0   : > { %v2825_v58 = vpop.f32.mrb[32].mxu0 }
 0x5c1   : > { %v2159_v60 = vadd.f32 %v2825_v58, %v3960_v4  ;;  %v2072_v62 = vpop.f32.mrb[33].mxu0 }
 0x5c2   : > { %v2158_v1 = vadd.f32 %v3960_v4, %v2072_v62 }
 0x5c3   : > { %v2445_v3 = vmul.f32 -1.442695, %v2159_v60 }
 0x5c4   : > { %v2444_v5 = vmul.f32 -1.442695, %v2158_v1 }
 0x5c5   : > { %3138 = vpow2.f32 %v2445_v3 }
 0x5c6   : > { %3140 = vpow2.f32 %v2444_v5 }
 0x5c8   : > { %v2828_v7 = vpop.f32.mrb[34].mxu0 }
 0x5c9   : > { %v2161_v17 = vadd.f32 %v2828_v7, %v3960_v4  ;;  %v2082_v46 = vpop.f32.mrb[35].mxu0 }
 0x5ca   : > { %v2160_v48 = vadd.f32 %v3960_v4, %v2082_v46 }
 0x5cb   : > { %v2447_v19 = vmul.f32 -1.442695, %v2161_v17 }
 0x5cc   : > { %v2446_v14 = vmul.f32 -1.442695, %v2160_v48 }
 0x5cd   : > { %3142 = vpow2.f32 %v2447_v19 }
 0x5ce   : > { %3144 = vpow2.f32 %v2446_v14 }
 0x5cf   : > { %v3139_v21 = vpop.eup %3138 }
 0x5d0   : > { %v3141_v23 = vpop.eup %3140  ;;  %v2223_v18 = vadd.f32 1.0, %v3139_v21  ;;  %v2831_v20 = vpop.f32.mrb[36].mxu0 }
 0x5d1   : > { %v2222_v24 = vadd.f32 1.0, %v3141_v23  ;;  %v2163_v10 = vadd.f32 %v2831_v20, %v3960_v4  ;;  %v2092_v28 = vpop.f32.mrb[37].mxu0 }
 0x5d2   : > { %3146 = vrcp.f32 %v2223_v18  ;;  %v2162_v30 = vadd.f32 %v3960_v4, %v2092_v28 }
 0x5d3   : > { %3148 = vrcp.f32 %v2222_v24  ;;  %v2449_v26 = vmul.f32 -1.442695, %v2163_v10 }
 0x5d4   : > { %v2448_v25 = vmul.f32 -1.442695, %v2162_v30 }
 0x5d5   : > { %3150 = vpow2.f32 %v2449_v26 }
 0x5d6   : > { %3152 = vpow2.f32 %v2448_v25 }
 0x5d7   : > { %v3143_v27 = vpop.eup %3142 }
 0x5d8   : > { %v2834_v29 = vpop.f32.mrb[38].mxu0  ;;  %v3145_v31 = vpop.eup %3144  ;;  %v2225_v32 = vadd.f32 1.0, %v3143_v27 }
 0x5d9   : > { %v2165_v6 = vadd.f32 %v2834_v29, %v3960_v4  ;;  %v2102_v34 = vpop.f32.mrb[39].mxu0  ;;  %v2224_v50 = vadd.f32 1.0, %v3145_v31 }
 0x5da   : > { %v2164_v12 = vadd.f32 %v3960_v4, %v2102_v34  ;;  %3154 = vrcp.f32 %v2225_v32 }
 0x5db   : > { %v2451_v49 = vmul.f32 -1.442695, %v2165_v6  ;;  %3156 = vrcp.f32 %v2224_v50 }
 0x5dc   : > { %v2450_v51 = vmul.f32 -1.442695, %v2164_v12  ;;  %v3147_v53 = vpop.eup %3146 }
 0x5dd   : > { %3158 = vpow2.f32 %v2451_v49  ;;  %v3149_v55 = vpop.eup %3148  ;;  %2271 = vst [vmem:[%s3974_s12 + $0x8] sm:$0xff] %v3147_v53 }
 0x5de   : > { %3160 = vpow2.f32 %v2450_v51  ;;  %2270 = vst [vmem:[%s3974_s12] sm:$0xff] %v3149_v55 }
 0x5df   : > { %v3151_v16 = vpop.eup %3150 }
 0x5e0   : > { %v2837_v36 = vpop.f32.mrb[64].mxu1  ;;  %v3153_v38 = vpop.eup %3152  ;;  %v2227_v33 = vadd.f32 1.0, %v3151_v16 }
 0x5e1   : > { %v2118_v35 = vadd.f32 %v2837_v36, %v3938_v8  ;;  %v2112_v37 = vpop.f32.mrb[65].mxu1  ;;  %v2226_v39 = vadd.f32 1.0, %v3153_v38 }
 0x5e2   : > { %v2113_v42 = vadd.f32 %v2112_v37, %v3940_v41  ;;  %3162 = vrcp.f32 %v2227_v33 }
 0x5e3   : > { %v2167_v44 = vadd.f32 %v3960_v4, %v2118_v35  ;;  %3164 = vrcp.f32 %v2226_v39 }
 0x5e4   : > { %v2166_v57 = vadd.f32 %v3960_v4, %v2113_v42  ;;  %v3155_v59 = vpop.eup %3154 }
 0x5e5   : > { %v2453_v61 = vmul.f32 -1.442695, %v2167_v44  ;;  %v3157_v63 = vpop.eup %3156  ;;  %2273 = vst [vmem:[%s3974_s12 + $0x18] sm:$0xff] %v3155_v59 }
 0x5e6   : > { %v2452_v13 = vmul.f32 -1.442695, %v2166_v57  ;;  %2272 = vst [vmem:[%s3974_s12 + $0x10] sm:$0xff] %v3157_v63 }
 0x5e7   : > { %v3159_v52 = vpop.eup %3158  ;;  %3166 = vpow2.f32 %v2453_v61 }
 0x5e8   : > { %v3161_v8 = vpop.eup %3160  ;;  %v2229_v15 = vadd.f32 1.0, %v3159_v52  ;;  %3168 = vpow2.f32 %v2452_v13  ;;  %v2840_v41 = vpop.f32.mrb[66].mxu1 }
 0x5e9   : > { %v2228_v22 = vadd.f32 1.0, %v3161_v8  ;;  %v2128_v54 = vadd.f32 %v2840_v41, %v3942_v43  ;;  %v2122_v9 = vpop.f32.mrb[67].mxu1 }
 0x5ea   : > { %3170 = vrcp.f32 %v2229_v15  ;;  %v2123_v56 = vadd.f32 %v2122_v9, %v3944_v0 }
 0x5eb   : > { %3172 = vrcp.f32 %v2228_v22  ;;  %v2169_v11 = vadd.f32 %v3960_v4, %v2128_v54 }
 0x5ec   : > { %v2168_v58 = vadd.f32 %v3960_v4, %v2123_v56  ;;  %v3163_v60 = vpop.eup %3162 }
 0x5ed   : > { %v2455_v62 = vmul.f32 -1.442695, %v2169_v11  ;;  %v3165_v1 = vpop.eup %3164  ;;  %2275 = vst [vmem:[%s3974_s12 + $0x28] sm:$0xff] %v3163_v60 }
 0x5ee   : > { %v2454_v3 = vmul.f32 -1.442695, %v2168_v58  ;;  %2274 = vst [vmem:[%s3974_s12 + $0x20] sm:$0xff] %v3165_v1 }
 0x5ef   : > { %3174 = vpow2.f32 %v2455_v62 }
 0x5f0   : > { %3176 = vpow2.f32 %v2454_v3  ;;  %v2843_v5 = vpop.f32.mrb[68].mxu1 }
 0x5f1   : > { %v3167_v43 = vpop.eup %3166  ;;  %v2138_v7 = vadd.f32 %v2843_v5, %v3946_v45  ;;  %v2132_v0 = vpop.f32.mrb[69].mxu1 }
 0x5f2   : > { %v3169_v17 = vpop.eup %3168  ;;  %v2231_v46 = vadd.f32 1.0, %v3167_v43  ;;  %v2133_v48 = vadd.f32 %v2132_v0, %v3948_v47 }
 0x5f3   : > { %v2230_v19 = vadd.f32 1.0, %v3169_v17  ;;  %v2171_v14 = vadd.f32 %v3960_v4, %v2138_v7 }
 0x5f4   : > { %v3171_v21 = vpop.eup %3170  ;;  %3178 = vrcp.f32 %v2231_v46  ;;  %v2170_v23 = vadd.f32 %v3960_v4, %v2133_v48 }
 0x5f5   : > { %v3173_v18 = vpop.eup %3172  ;;  %2277 = vst [vmem:[%s3974_s12 + $0x38] sm:$0xff] %v3171_v21  ;;  %3180 = vrcp.f32 %v2230_v19  ;;  %v2457_v20 = vmul.f32 -1.442695, %v2171_v14 }
 0x5f6   : > { %2276 = vst [vmem:[%s3974_s12 + $0x30] sm:$0xff] %v3173_v18  ;;  %v2456_v24 = vmul.f32 -1.442695, %v2170_v23 }
 0x5f7   : > { %3182 = vpow2.f32 %v2457_v20 }
 0x5f8   : > { %3184 = vpow2.f32 %v2456_v24  ;;  %v2846_v45 = vpop.f32.mrb[70].mxu1 }
 0x5f9   : > { %v3175_v10 = vpop.eup %3174  ;;  %v2148_v47 = vadd.f32 %v2846_v45, %v3950_v2  ;;  %v2142_v28 = vpop.f32.mrb[71].mxu1 }
 0x5fa   : > { %v3177_v30 = vpop.eup %3176  ;;  %v2233_v26 = vadd.f32 1.0, %v3175_v10  ;;  %v2143_v25 = vadd.f32 %v2142_v28, %v3952_v40 }
 0x5fb   : > { %v2232_v27 = vadd.f32 1.0, %v3177_v30  ;;  %v2173_v29 = vadd.f32 %v3960_v4, %v2148_v47 }
 0x5fc   : > { %3186 = vrcp.f32 %v2233_v26  ;;  %v2172_v31 = vadd.f32 %v3960_v4, %v2143_v25 }
 0x5fd   : > { %3188 = vrcp.f32 %v2232_v27  ;;  %v2459_v32 = vmul.f32 -1.442695, %v2173_v29 }
 0x5fe   : > { %v3179_v6 = vpop.eup %3178  ;;  %v2458_v34 = vmul.f32 -1.442695, %v2172_v31 }
 0x5ff   : > { %v3181_v50 = vpop.eup %3180  ;;  %2279 = vst [vmem:[%s3974_s12 + $0x48] sm:$0xff] %v3179_v6  ;;  %3190 = vpow2.f32 %v2459_v32 }
 0x600   : > { %2278 = vst [vmem:[%s3974_s12 + $0x40] sm:$0xff] %v3181_v50  ;;  %3192 = vpow2.f32 %v2458_v34 }
 0x601   : > { %v3183_v2 = vpop.eup %3182 }
 0x602   : > { %v3185_v12 = vpop.eup %3184  ;;  %v2235_v40 = vadd.f32 1.0, %v3183_v2 }
 0x603   : > { %v2234_v49 = vadd.f32 1.0, %v3185_v12 }
 0x604   : > { %3194 = vrcp.f32 %v2235_v40 }
 0x605   : > { %3196 = vrcp.f32 %v2234_v49 }
 0x606   : > { %v3187_v4 = vpop.eup %3186 }
 0x607   : > { %v3189_v51 = vpop.eup %3188  ;;  %2281 = vst [vmem:[%s3974_s12 + $0x58] sm:$0xff] %v3187_v4 }
 0x608   : > { %2280 = vst [vmem:[%s3974_s12 + $0x50] sm:$0xff] %v3189_v51 }
 0x609   : > { %v3191_v53 = vpop.eup %3190 }
 0x60a   : > { %v3193_v55 = vpop.eup %3192  ;;  %v2237_v16 = vadd.f32 1.0, %v3191_v53 }
 0x60b   : > { %v2236_v36 = vadd.f32 1.0, %v3193_v55 }
 0x60c   : > { %3198 = vrcp.f32 %v2237_v16 }
 0x60d   : > { %3200 = vrcp.f32 %v2236_v36 }
 0x60e   : > { %v3195_v38 = vpop.eup %3194 }
 0x60f   : > { %v3197_v33 = vpop.eup %3196  ;;  %2283 = vst [vmem:[%s3974_s12 + $0x68] sm:$0xff] %v3195_v38 }
 0x610   : > { %2282 = vst [vmem:[%s3974_s12 + $0x60] sm:$0xff] %v3197_v33 }
 0x616   : > { %v3199_v35 = vpop.eup %3198 }
 0x617   : > { %v3201_v37 = vpop.eup %3200  ;;  %2285 = vst [vmem:[%s3974_s12 + $0x78] sm:$0xff] %v3199_v35 }
 0x618   : > { %2284 = vst [vmem:[%s3974_s12 + $0x70] sm:$0xff] %v3201_v37 }
 0x619 PF: > { %s19_s30 = sadd.s32 1, %s3208_s30  }
 0x61a   : > { %p16_p4 = scmp.ge.s32.totalorder %s19_s30, 4  }
 0x61c   :  { %18 = sbr.rel (!%p16_p4) target bundleno = 1 (0x1), region = 88 }

</bundles_post_ra>
